<compile_context>
chip_gen: v6e
topology: v6e:2x2x1
jax: 0.10.0
libtpu: 0.0.40
codegen_flags: <defaults>
</compile_context>

<pallas_src>
import math

import jax
import jax.numpy as jnp
from jax import lax
from jax.experimental import pallas as pl
from jax.experimental.pallas import tpu as pltpu


def rnn_classifier_kernel(x_ref,
                          w_ih0_ref, b0_ref, w_hh0f_ref, w_hh0b_ref,
                          w1f_ref, w1b_ref, b1_ref, w_hh1f_ref, w_hh1b_ref,
                          proj_w_ref, proj_b_ref,
                          out_ref,
                          xpf_scr, xpb_scr, out0f_scr, out0b_scr):
    Bp = out_ref.shape[0]
    H = w_hh0f_ref.shape[0]
    T = x_ref.shape[0] // Bp

    w_hh0f = w_hh0f_ref[...]
    w_hh0b = w_hh0b_ref[...]
    w_hh1f = w_hh1f_ref[...]
    w_hh1b = w_hh1b_ref[...]

    # ---- layer 0: input projections for all timesteps & both directions (one dot) ----
    xp0 = jnp.dot(x_ref[...], w_ih0_ref[...],
                  preferred_element_type=jnp.float32) + b0_ref[...]      # (T*Bp, 2H)
    xpf_scr[...] = xp0[:, :H]
    xpb_scr[...] = xp0[:, H:]

    # ---- layer 0 recurrence: fwd & bwd chains interleaved; step 0 peeled (h0 == 0) ----
    h_f = jnp.tanh(xpf_scr[pl.ds(0, Bp), :])                 # fwd processes t = 0
    h_b = jnp.tanh(xpb_scr[pl.ds((T - 1) * Bp, Bp), :])      # bwd processes t = T-1
    out0f_scr[pl.ds(0, Bp), :] = h_f
    out0b_scr[pl.ds((T - 1) * Bp, Bp), :] = h_b

    def l0_step(s, carry):
        hf, hb = carry
        sf = pl.multiple_of(s * Bp, Bp)                  # fwd: t = s
        sb = pl.multiple_of((T - 1 - s) * Bp, Bp)        # bwd: t = T-1-s
        hf = jnp.tanh(xpf_scr[pl.ds(sf, Bp), :]
                      + jnp.dot(hf, w_hh0f, preferred_element_type=jnp.float32))
        hb = jnp.tanh(xpb_scr[pl.ds(sb, Bp), :]
                      + jnp.dot(hb, w_hh0b, preferred_element_type=jnp.float32))
        out0f_scr[pl.ds(sf, Bp), :] = hf
        out0b_scr[pl.ds(sb, Bp), :] = hb
        return hf, hb

    h0f, h0b = lax.fori_loop(1, T, l0_step, (h_f, h_b), unroll=True)

    # ---- layer 1: input projections (input = [fwd_out | bwd_out]); no concatenate ----
    xp1 = (jnp.dot(out0f_scr[...], w1f_ref[...], preferred_element_type=jnp.float32)
           + jnp.dot(out0b_scr[...], w1b_ref[...], preferred_element_type=jnp.float32)
           + b1_ref[...])                                                # (T*Bp, 2H)
    xpf_scr[...] = xp1[:, :H]
    xpb_scr[...] = xp1[:, H:]

    # ---- layer 1 recurrence (only final hiddens needed) ----
    h_f = jnp.tanh(xpf_scr[pl.ds(0, Bp), :])
    h_b = jnp.tanh(xpb_scr[pl.ds((T - 1) * Bp, Bp), :])

    def l1_step(s, carry):
        hf, hb = carry
        sf = pl.multiple_of(s * Bp, Bp)
        sb = pl.multiple_of((T - 1 - s) * Bp, Bp)
        hf = jnp.tanh(xpf_scr[pl.ds(sf, Bp), :]
                      + jnp.dot(hf, w_hh1f, preferred_element_type=jnp.float32))
        hb = jnp.tanh(xpb_scr[pl.ds(sb, Bp), :]
                      + jnp.dot(hb, w_hh1b, preferred_element_type=jnp.float32))
        return hf, hb

    h1f, h1b = lax.fori_loop(1, T, l1_step, (h_f, h_b), unroll=True)

    # ---- h_n.permute(1,0,2).view(B, 4H) -> [l0_fwd, l0_bwd, l1_fwd, l1_bwd]; proj ----
    hcat = jnp.concatenate([h0f, h0b, h1f, h1b], axis=-1)                # (Bp, 4H)
    out_ref[...] = (jnp.dot(hcat, proj_w_ref[...],
                            preferred_element_type=jnp.float32) + proj_b_ref[...])


@jax.jit
def rnn_classifier_forward(token_ids, params):
    B, T = token_ids.shape
    H = params["w_hh_l0"].shape[0]
    C = params["proj_w"].shape[0]

    Bp = max(8, ((B + 7) // 8) * 8)            # pad batch (sublane) dim
    Cp = max(128, ((C + 127) // 128) * 128)    # pad class (lane) dim

    # Embedding gather (glue, plain JAX) -> time-major, batch-padded, flattened.
    emb = params["embedding"][token_ids].astype(jnp.float32)      # (B, T, E)
    x = jnp.transpose(emb, (1, 0, 2))                             # (T, B, E)
    x = jnp.pad(x, ((0, 0), (0, Bp - B), (0, 0)))
    x_flat = x.reshape(T * Bp, -1)                                # (T*Bp, E)

    f32 = lambda a: a.astype(jnp.float32)
    # Layer 0: fuse fwd/bwd input weights along the output dim, fold both biases.
    w_ih0 = jnp.concatenate([f32(params["w_ih_l0"]).T, f32(params["w_ih_l0r"]).T], axis=1)
    b0 = jnp.concatenate([f32(params["b_ih_l0"] + params["b_hh_l0"]),
                          f32(params["b_ih_l0r"] + params["b_hh_l0r"])]).reshape(1, 2 * H)
    w_hh0f = f32(params["w_hh_l0"]).T
    w_hh0b = f32(params["w_hh_l0r"]).T
    # Layer 1: input is [fwd_out | bwd_out]; split the transposed (2H, H) input weights
    # by source half and fuse the two directions along the output dim.
    w_ih1f = f32(params["w_ih_l1"]).T      # (2H, H)
    w_ih1b = f32(params["w_ih_l1r"]).T     # (2H, H)
    w1_from_f = jnp.concatenate([w_ih1f[:H], w_ih1b[:H]], axis=1)   # (H, 2H)
    w1_from_b = jnp.concatenate([w_ih1f[H:], w_ih1b[H:]], axis=1)   # (H, 2H)
    b1 = jnp.concatenate([f32(params["b_ih_l1"] + params["b_hh_l1"]),
                          f32(params["b_ih_l1r"] + params["b_hh_l1r"])]).reshape(1, 2 * H)
    w_hh1f = f32(params["w_hh_l1"]).T
    w_hh1b = f32(params["w_hh_l1r"]).T
    # Projection: pre-transpose, zero-pad the class dim to a full lane width.
    proj_w = jnp.zeros((4 * H, Cp), jnp.float32).at[:, :C].set(f32(params["proj_w"]).T)
    proj_b = jnp.zeros((1, Cp), jnp.float32).at[:, :C].set(f32(params["proj_b"]))

    inputs = [x_flat, w_ih0, b0, w_hh0f, w_hh0b,
              w1_from_f, w1_from_b, b1, w_hh1f, w_hh1b, proj_w, proj_b]

    vmem = pl.BlockSpec(memory_space=pltpu.MemorySpace.VMEM)
    out = pl.pallas_call(
        rnn_classifier_kernel,
        out_shape=jax.ShapeDtypeStruct((Bp, Cp), jnp.float32),
        in_specs=[vmem] * len(inputs),
        out_specs=vmem,
        scratch_shapes=[pltpu.VMEM((T * Bp, H), jnp.float32),   # input proj, fwd dir
                        pltpu.VMEM((T * Bp, H), jnp.float32),   # input proj, bwd dir
                        pltpu.VMEM((T * Bp, H), jnp.float32),   # layer-0 outputs, fwd
                        pltpu.VMEM((T * Bp, H), jnp.float32)],  # layer-0 outputs, bwd
    )(*inputs)
    # TODO(synk): for large T/B (esp. v7x 64 MiB VMEM) tile x over T with a grid and
    # add a "parallel" batch grid axis; unnecessary at this toy size.
    return out[:B, :C]


def rnn_classifier_reference(token_ids, params):
    """Pure-JAX reference mirroring the PyTorch module (correctness check only)."""
    hp = jax.lax.Precision.HIGHEST
    emb = params["embedding"][token_ids].astype(jnp.float32)     # (B, T, E)
    x = jnp.transpose(emb, (1, 0, 2))                            # (T, B, E)
    _, B, _ = x.shape
    H = params["w_hh_l0"].shape[0]

    def run_dir(xs, suf, reverse):
        w_ih, w_hh = params[f"w_ih_{suf}"], params[f"w_hh_{suf}"]
        b = params[f"b_ih_{suf}"] + params[f"b_hh_{suf}"]

        def step(h, xt):
            h = jnp.tanh(jnp.dot(xt, w_ih.T, precision=hp)
                         + jnp.dot(h, w_hh.T, precision=hp) + b)
            return h, h

        seq = xs[::-1] if reverse else xs
        h_last, outs = lax.scan(step, jnp.zeros((B, H), jnp.float32), seq)
        return h_last, (outs[::-1] if reverse else outs)

    h0f, o0f = run_dir(x, "l0", False)
    h0b, o0b = run_dir(x, "l0r", True)
    x1 = jnp.concatenate([o0f, o0b], axis=-1)
    h1f, _ = run_dir(x1, "l1", False)
    h1b, _ = run_dir(x1, "l1r", True)
    hcat = jnp.concatenate([h0f, h0b, h1f, h1b], axis=-1)        # (B, 4H)
    return jnp.dot(hcat, params["proj_w"].T, precision=hp) + params["proj_b"]


def init_params(key, vocab_size, embed_size, hidden_size, num_classes):
    """Deterministic parameter init matching the torch module's shapes."""
    ks = jax.random.split(key, 32)
    ki = iter(ks)
    k = 1.0 / math.sqrt(hidden_size)

    def u(key_, shape):
        return jax.random.uniform(key_, shape, jnp.float32, -k, k)

    p = {"embedding": jax.random.normal(next(ki), (vocab_size, embed_size), jnp.float32)}
    for suf, in_sz in (("l0", embed_size), ("l0r", embed_size),
                       ("l1", 2 * hidden_size), ("l1r", 2 * hidden_size)):
        p[f"w_ih_{suf}"] = u(next(ki), (hidden_size, in_sz))
        p[f"w_hh_{suf}"] = u(next(ki), (hidden_size, hidden_size))
        p[f"b_ih_{suf}"] = u(next(ki), (hidden_size,))
        p[f"b_hh_{suf}"] = u(next(ki), (hidden_size,))
    p["proj_w"] = u(next(ki), (num_classes, 4 * hidden_size))
    p["proj_b"] = u(next(ki), (num_classes,))
    return p


if __name__ == "__main__":
    BATCH, SEQ = 2, 8
    VOCAB, EMBED, HIDDEN, NUM_CLASSES = 50, 32, 32, 4

    key = jax.random.PRNGKey(0)
    k_tok, k_par = jax.random.split(key)
    params = init_params(k_par, VOCAB, EMBED, HIDDEN, NUM_CLASSES)
    token_ids = jax.random.randint(k_tok, (BATCH, SEQ), 0, VOCAB, dtype=jnp.int32)

    logits = rnn_classifier_forward(token_ids, params)
    jax.block_until_ready(logits)
    assert logits.shape == (BATCH, NUM_CLASSES)
    assert bool(jnp.all(jnp.isfinite(logits)))

    ref = rnn_classifier_reference(token_ids, params)
    assert jnp.allclose(logits, ref, atol=2e-2, rtol=2e-2), (logits, ref)
    print("KERNEL_OK")
</pallas_src>

<mosaic_0001>
module attributes {stable_mosaic.version = 11 : i64} {
  func.func @rnn_classifier_kernel(%arg0: memref<64x32xf32, #tpu.memory_space<vmem>>, %arg1: memref<32x64xf32, #tpu.memory_space<vmem>>, %arg2: memref<1x64xf32, #tpu.memory_space<vmem>>, %arg3: memref<32x32xf32, #tpu.memory_space<vmem>>, %arg4: memref<32x32xf32, #tpu.memory_space<vmem>>, %arg5: memref<32x64xf32, #tpu.memory_space<vmem>>, %arg6: memref<32x64xf32, #tpu.memory_space<vmem>>, %arg7: memref<1x64xf32, #tpu.memory_space<vmem>>, %arg8: memref<32x32xf32, #tpu.memory_space<vmem>>, %arg9: memref<32x32xf32, #tpu.memory_space<vmem>>, %arg10: memref<128x128xf32, #tpu.memory_space<vmem>>, %arg11: memref<1x128xf32, #tpu.memory_space<vmem>>, %arg12: memref<8x128xf32, #tpu.memory_space<vmem>>, %arg13: memref<64x32xf32, #tpu.memory_space<vmem>>, %arg14: memref<64x32xf32, #tpu.memory_space<vmem>>, %arg15: memref<64x32xf32, #tpu.memory_space<vmem>>, %arg16: memref<64x32xf32, #tpu.memory_space<vmem>>) attributes {dimension_semantics = [], scalar_prefetch = 0 : i64, scratch_operands = 4 : i64, tpu.core_type = #tpu.core_type<tc>} {
    %c0 = arith.constant 0 : index
    %c0_0 = arith.constant 0 : index
    %0 = vector.load %arg3[%c0, %c0_0] : memref<32x32xf32, #tpu.memory_space<vmem>>, vector<32x32xf32>
    %c0_1 = arith.constant 0 : index
    %c0_2 = arith.constant 0 : index
    %1 = vector.load %arg4[%c0_1, %c0_2] : memref<32x32xf32, #tpu.memory_space<vmem>>, vector<32x32xf32>
    %c0_3 = arith.constant 0 : index
    %c0_4 = arith.constant 0 : index
    %2 = vector.load %arg8[%c0_3, %c0_4] : memref<32x32xf32, #tpu.memory_space<vmem>>, vector<32x32xf32>
    %c0_5 = arith.constant 0 : index
    %c0_6 = arith.constant 0 : index
    %3 = vector.load %arg9[%c0_5, %c0_6] : memref<32x32xf32, #tpu.memory_space<vmem>>, vector<32x32xf32>
    %c0_7 = arith.constant 0 : index
    %c0_8 = arith.constant 0 : index
    %4 = vector.load %arg0[%c0_7, %c0_8] : memref<64x32xf32, #tpu.memory_space<vmem>>, vector<64x32xf32>
    %c0_9 = arith.constant 0 : index
    %c0_10 = arith.constant 0 : index
    %5 = vector.load %arg1[%c0_9, %c0_10] : memref<32x64xf32, #tpu.memory_space<vmem>>, vector<32x64xf32>
    %cst = arith.constant dense<0.000000e+00> : vector<64x64xf32>
    %6 = tpu.matmul %4, %5, %cst {dimension_numbers = #tpu.dot_dimension_numbers<[1], [0], [0], [1], [0, 0, 1, 1], [], []>} : vector<64x32xf32>, vector<32x64xf32>, vector<64x64xf32> -> vector<64x64xf32>
    %c0_11 = arith.constant 0 : index
    %c0_12 = arith.constant 0 : index
    %7 = vector.load %arg2[%c0_11, %c0_12] : memref<1x64xf32, #tpu.memory_space<vmem>>, vector<1x64xf32>
    %8 = vector.broadcast %7 : vector<1x64xf32> to vector<64x64xf32>
    %9 = arith.addf %6, %8 : vector<64x64xf32>
    %10 = vector.extract_strided_slice %9 {offsets = [0, 0], sizes = [64, 32], strides = [1, 1]} : vector<64x64xf32> to vector<64x32xf32>
    %c0_13 = arith.constant 0 : index
    %c0_14 = arith.constant 0 : index
    %11 = vector.load %arg13[%c0_13, %c0_14] : memref<64x32xf32, #tpu.memory_space<vmem>>, vector<64x32xf32>
    tpu.vector_store %arg13[%c0_13, %c0_14], %10 {strides = array<i32>} : memref<64x32xf32, #tpu.memory_space<vmem>>, vector<64x32xf32>,
    %12 = vector.extract_strided_slice %9 {offsets = [0, 32], sizes = [64, 32], strides = [1, 1]} : vector<64x64xf32> to vector<64x32xf32>
    %c0_15 = arith.constant 0 : index
    %c0_16 = arith.constant 0 : index
    %13 = vector.load %arg14[%c0_15, %c0_16] : memref<64x32xf32, #tpu.memory_space<vmem>>, vector<64x32xf32>
    tpu.vector_store %arg14[%c0_15, %c0_16], %12 {strides = array<i32>} : memref<64x32xf32, #tpu.memory_space<vmem>>, vector<64x32xf32>,
    %c0_17 = arith.constant 0 : index
    %c0_18 = arith.constant 0 : index
    %14 = vector.load %arg13[%c0_17, %c0_18] : memref<64x32xf32, #tpu.memory_space<vmem>>, vector<8x32xf32>
    %15 = math.tanh %14 : vector<8x32xf32>
    %c56 = arith.constant 56 : index
    %c0_19 = arith.constant 0 : index
    %16 = vector.load %arg14[%c56, %c0_19] : memref<64x32xf32, #tpu.memory_space<vmem>>, vector<8x32xf32>
    %17 = math.tanh %16 : vector<8x32xf32>
    %c0_20 = arith.constant 0 : index
    %c0_21 = arith.constant 0 : index
    %18 = vector.load %arg15[%c0_20, %c0_21] : memref<64x32xf32, #tpu.memory_space<vmem>>, vector<8x32xf32>
    tpu.vector_store %arg15[%c0_20, %c0_21], %15 {strides = array<i32>} : memref<64x32xf32, #tpu.memory_space<vmem>>, vector<8x32xf32>,
    %c56_22 = arith.constant 56 : index
    %c0_23 = arith.constant 0 : index
    %19 = vector.load %arg16[%c56_22, %c0_23] : memref<64x32xf32, #tpu.memory_space<vmem>>, vector<8x32xf32>
    tpu.vector_store %arg16[%c56_22, %c0_23], %17 {strides = array<i32>} : memref<64x32xf32, #tpu.memory_space<vmem>>, vector<8x32xf32>,
    %c1_i32 = arith.constant 1 : i32
    %c8_i32 = arith.constant 8 : i32
    %20 = arith.muli %c1_i32, %c8_i32 : i32
    %21 = tpu.assume_multiple %20, 8 : i32
    %c7_i32 = arith.constant 7 : i32
    %22 = arith.subi %c7_i32, %c1_i32 : i32
    %c8_i32_24 = arith.constant 8 : i32
    %23 = arith.muli %22, %c8_i32_24 : i32
    %24 = tpu.assume_multiple %23, 8 : i32
    %25 = arith.index_cast %21 : i32 to index
    %c0_25 = arith.constant 0 : index
    %26 = vector.load %arg13[%25, %c0_25] : memref<64x32xf32, #tpu.memory_space<vmem>>, vector<8x32xf32>
    %cst_26 = arith.constant dense<0.000000e+00> : vector<8x32xf32>
    %27 = tpu.matmul %15, %0, %cst_26 {dimension_numbers = #tpu.dot_dimension_numbers<[1], [0], [0], [1], [0, 0, 1, 1], [], []>} : vector<8x32xf32>, vector<32x32xf32>, vector<8x32xf32> -> vector<8x32xf32>
    %28 = arith.addf %26, %27 : vector<8x32xf32>
    %29 = math.tanh %28 : vector<8x32xf32>
    %30 = arith.index_cast %24 : i32 to index
    %c0_27 = arith.constant 0 : index
    %31 = vector.load %arg14[%30, %c0_27] : memref<64x32xf32, #tpu.memory_space<vmem>>, vector<8x32xf32>
    %cst_28 = arith.constant dense<0.000000e+00> : vector<8x32xf32>
    %32 = tpu.matmul %17, %1, %cst_28 {dimension_numbers = #tpu.dot_dimension_numbers<[1], [0], [0], [1], [0, 0, 1, 1], [], []>} : vector<8x32xf32>, vector<32x32xf32>, vector<8x32xf32> -> vector<8x32xf32>
    %33 = arith.addf %31, %32 : vector<8x32xf32>
    %34 = math.tanh %33 : vector<8x32xf32>
    %35 = arith.index_cast %21 : i32 to index
    %c0_29 = arith.constant 0 : index
    %36 = vector.load %arg15[%35, %c0_29] : memref<64x32xf32, #tpu.memory_space<vmem>>, vector<8x32xf32>
    tpu.vector_store %arg15[%35, %c0_29], %29 {strides = array<i32>} : memref<64x32xf32, #tpu.memory_space<vmem>>, vector<8x32xf32>,
    %37 = arith.index_cast %24 : i32 to index
    %c0_30 = arith.constant 0 : index
    %38 = vector.load %arg16[%37, %c0_30] : memref<64x32xf32, #tpu.memory_space<vmem>>, vector<8x32xf32>
    tpu.vector_store %arg16[%37, %c0_30], %34 {strides = array<i32>} : memref<64x32xf32, #tpu.memory_space<vmem>>, vector<8x32xf32>,
    %c2_i32 = arith.constant 2 : i32
    %c8_i32_31 = arith.constant 8 : i32
    %39 = arith.muli %c2_i32, %c8_i32_31 : i32
    %40 = tpu.assume_multiple %39, 8 : i32
    %c7_i32_32 = arith.constant 7 : i32
    %41 = arith.subi %c7_i32_32, %c2_i32 : i32
    %c8_i32_33 = arith.constant 8 : i32
    %42 = arith.muli %41, %c8_i32_33 : i32
    %43 = tpu.assume_multiple %42, 8 : i32
    %44 = arith.index_cast %40 : i32 to index
    %c0_34 = arith.constant 0 : index
    %45 = vector.load %arg13[%44, %c0_34] : memref<64x32xf32, #tpu.memory_space<vmem>>, vector<8x32xf32>
    %cst_35 = arith.constant dense<0.000000e+00> : vector<8x32xf32>
    %46 = tpu.matmul %29, %0, %cst_35 {dimension_numbers = #tpu.dot_dimension_numbers<[1], [0], [0], [1], [0, 0, 1, 1], [], []>} : vector<8x32xf32>, vector<32x32xf32>, vector<8x32xf32> -> vector<8x32xf32>
    %47 = arith.addf %45, %46 : vector<8x32xf32>
    %48 = math.tanh %47 : vector<8x32xf32>
    %49 = arith.index_cast %43 : i32 to index
    %c0_36 = arith.constant 0 : index
    %50 = vector.load %arg14[%49, %c0_36] : memref<64x32xf32, #tpu.memory_space<vmem>>, vector<8x32xf32>
    %cst_37 = arith.constant dense<0.000000e+00> : vector<8x32xf32>
    %51 = tpu.matmul %34, %1, %cst_37 {dimension_numbers = #tpu.dot_dimension_numbers<[1], [0], [0], [1], [0, 0, 1, 1], [], []>} : vector<8x32xf32>, vector<32x32xf32>, vector<8x32xf32> -> vector<8x32xf32>
    %52 = arith.addf %50, %51 : vector<8x32xf32>
    %53 = math.tanh %52 : vector<8x32xf32>
    %54 = arith.index_cast %40 : i32 to index
    %c0_38 = arith.constant 0 : index
    %55 = vector.load %arg15[%54, %c0_38] : memref<64x32xf32, #tpu.memory_space<vmem>>, vector<8x32xf32>
    tpu.vector_store %arg15[%54, %c0_38], %48 {strides = array<i32>} : memref<64x32xf32, #tpu.memory_space<vmem>>, vector<8x32xf32>,
    %56 = arith.index_cast %43 : i32 to index
    %c0_39 = arith.constant 0 : index
    %57 = vector.load %arg16[%56, %c0_39] : memref<64x32xf32, #tpu.memory_space<vmem>>, vector<8x32xf32>
    tpu.vector_store %arg16[%56, %c0_39], %53 {strides = array<i32>} : memref<64x32xf32, #tpu.memory_space<vmem>>, vector<8x32xf32>,
    %c3_i32 = arith.constant 3 : i32
    %c8_i32_40 = arith.constant 8 : i32
    %58 = arith.muli %c3_i32, %c8_i32_40 : i32
    %59 = tpu.assume_multiple %58, 8 : i32
    %c7_i32_41 = arith.constant 7 : i32
    %60 = arith.subi %c7_i32_41, %c3_i32 : i32
    %c8_i32_42 = arith.constant 8 : i32
    %61 = arith.muli %60, %c8_i32_42 : i32
    %62 = tpu.assume_multiple %61, 8 : i32
    %63 = arith.index_cast %59 : i32 to index
    %c0_43 = arith.constant 0 : index
    %64 = vector.load %arg13[%63, %c0_43] : memref<64x32xf32, #tpu.memory_space<vmem>>, vector<8x32xf32>
    %cst_44 = arith.constant dense<0.000000e+00> : vector<8x32xf32>
    %65 = tpu.matmul %48, %0, %cst_44 {dimension_numbers = #tpu.dot_dimension_numbers<[1], [0], [0], [1], [0, 0, 1, 1], [], []>} : vector<8x32xf32>, vector<32x32xf32>, vector<8x32xf32> -> vector<8x32xf32>
    %66 = arith.addf %64, %65 : vector<8x32xf32>
    %67 = math.tanh %66 : vector<8x32xf32>
    %68 = arith.index_cast %62 : i32 to index
    %c0_45 = arith.constant 0 : index
    %69 = vector.load %arg14[%68, %c0_45] : memref<64x32xf32, #tpu.memory_space<vmem>>, vector<8x32xf32>
    %cst_46 = arith.constant dense<0.000000e+00> : vector<8x32xf32>
    %70 = tpu.matmul %53, %1, %cst_46 {dimension_numbers = #tpu.dot_dimension_numbers<[1], [0], [0], [1], [0, 0, 1, 1], [], []>} : vector<8x32xf32>, vector<32x32xf32>, vector<8x32xf32> -> vector<8x32xf32>
    %71 = arith.addf %69, %70 : vector<8x32xf32>
    %72 = math.tanh %71 : vector<8x32xf32>
    %73 = arith.index_cast %59 : i32 to index
    %c0_47 = arith.constant 0 : index
    %74 = vector.load %arg15[%73, %c0_47] : memref<64x32xf32, #tpu.memory_space<vmem>>, vector<8x32xf32>
    tpu.vector_store %arg15[%73, %c0_47], %67 {strides = array<i32>} : memref<64x32xf32, #tpu.memory_space<vmem>>, vector<8x32xf32>,
    %75 = arith.index_cast %62 : i32 to index
    %c0_48 = arith.constant 0 : index
    %76 = vector.load %arg16[%75, %c0_48] : memref<64x32xf32, #tpu.memory_space<vmem>>, vector<8x32xf32>
    tpu.vector_store %arg16[%75, %c0_48], %72 {strides = array<i32>} : memref<64x32xf32, #tpu.memory_space<vmem>>, vector<8x32xf32>,
    %c4_i32 = arith.constant 4 : i32
    %c8_i32_49 = arith.constant 8 : i32
    %77 = arith.muli %c4_i32, %c8_i32_49 : i32
    %78 = tpu.assume_multiple %77, 8 : i32
    %c7_i32_50 = arith.constant 7 : i32
    %79 = arith.subi %c7_i32_50, %c4_i32 : i32
    %c8_i32_51 = arith.constant 8 : i32
    %80 = arith.muli %79, %c8_i32_51 : i32
    %81 = tpu.assume_multiple %80, 8 : i32
    %82 = arith.index_cast %78 : i32 to index
    %c0_52 = arith.constant 0 : index
    %83 = vector.load %arg13[%82, %c0_52] : memref<64x32xf32, #tpu.memory_space<vmem>>, vector<8x32xf32>
    %cst_53 = arith.constant dense<0.000000e+00> : vector<8x32xf32>
    %84 = tpu.matmul %67, %0, %cst_53 {dimension_numbers = #tpu.dot_dimension_numbers<[1], [0], [0], [1], [0, 0, 1, 1], [], []>} : vector<8x32xf32>, vector<32x32xf32>, vector<8x32xf32> -> vector<8x32xf32>
    %85 = arith.addf %83, %84 : vector<8x32xf32>
    %86 = math.tanh %85 : vector<8x32xf32>
    %87 = arith.index_cast %81 : i32 to index
    %c0_54 = arith.constant 0 : index
    %88 = vector.load %arg14[%87, %c0_54] : memref<64x32xf32, #tpu.memory_space<vmem>>, vector<8x32xf32>
    %cst_55 = arith.constant dense<0.000000e+00> : vector<8x32xf32>
    %89 = tpu.matmul %72, %1, %cst_55 {dimension_numbers = #tpu.dot_dimension_numbers<[1], [0], [0], [1], [0, 0, 1, 1], [], []>} : vector<8x32xf32>, vector<32x32xf32>, vector<8x32xf32> -> vector<8x32xf32>
    %90 = arith.addf %88, %89 : vector<8x32xf32>
    %91 = math.tanh %90 : vector<8x32xf32>
    %92 = arith.index_cast %78 : i32 to index
    %c0_56 = arith.constant 0 : index
    %93 = vector.load %arg15[%92, %c0_56] : memref<64x32xf32, #tpu.memory_space<vmem>>, vector<8x32xf32>
    tpu.vector_store %arg15[%92, %c0_56], %86 {strides = array<i32>} : memref<64x32xf32, #tpu.memory_space<vmem>>, vector<8x32xf32>,
    %94 = arith.index_cast %81 : i32 to index
    %c0_57 = arith.constant 0 : index
    %95 = vector.load %arg16[%94, %c0_57] : memref<64x32xf32, #tpu.memory_space<vmem>>, vector<8x32xf32>
    tpu.vector_store %arg16[%94, %c0_57], %91 {strides = array<i32>} : memref<64x32xf32, #tpu.memory_space<vmem>>, vector<8x32xf32>,
    %c5_i32 = arith.constant 5 : i32
    %c8_i32_58 = arith.constant 8 : i32
    %96 = arith.muli %c5_i32, %c8_i32_58 : i32
    %97 = tpu.assume_multiple %96, 8 : i32
    %c7_i32_59 = arith.constant 7 : i32
    %98 = arith.subi %c7_i32_59, %c5_i32 : i32
    %c8_i32_60 = arith.constant 8 : i32
    %99 = arith.muli %98, %c8_i32_60 : i32
    %100 = tpu.assume_multiple %99, 8 : i32
    %101 = arith.index_cast %97 : i32 to index
    %c0_61 = arith.constant 0 : index
    %102 = vector.load %arg13[%101, %c0_61] : memref<64x32xf32, #tpu.memory_space<vmem>>, vector<8x32xf32>
    %cst_62 = arith.constant dense<0.000000e+00> : vector<8x32xf32>
    %103 = tpu.matmul %86, %0, %cst_62 {dimension_numbers = #tpu.dot_dimension_numbers<[1], [0], [0], [1], [0, 0, 1, 1], [], []>} : vector<8x32xf32>, vector<32x32xf32>, vector<8x32xf32> -> vector<8x32xf32>
    %104 = arith.addf %102, %103 : vector<8x32xf32>
    %105 = math.tanh %104 : vector<8x32xf32>
    %106 = arith.index_cast %100 : i32 to index
    %c0_63 = arith.constant 0 : index
    %107 = vector.load %arg14[%106, %c0_63] : memref<64x32xf32, #tpu.memory_space<vmem>>, vector<8x32xf32>
    %cst_64 = arith.constant dense<0.000000e+00> : vector<8x32xf32>
    %108 = tpu.matmul %91, %1, %cst_64 {dimension_numbers = #tpu.dot_dimension_numbers<[1], [0], [0], [1], [0, 0, 1, 1], [], []>} : vector<8x32xf32>, vector<32x32xf32>, vector<8x32xf32> -> vector<8x32xf32>
    %109 = arith.addf %107, %108 : vector<8x32xf32>
    %110 = math.tanh %109 : vector<8x32xf32>
    %111 = arith.index_cast %97 : i32 to index
    %c0_65 = arith.constant 0 : index
    %112 = vector.load %arg15[%111, %c0_65] : memref<64x32xf32, #tpu.memory_space<vmem>>, vector<8x32xf32>
    tpu.vector_store %arg15[%111, %c0_65], %105 {strides = array<i32>} : memref<64x32xf32, #tpu.memory_space<vmem>>, vector<8x32xf32>,
    %113 = arith.index_cast %100 : i32 to index
    %c0_66 = arith.constant 0 : index
    %114 = vector.load %arg16[%113, %c0_66] : memref<64x32xf32, #tpu.memory_space<vmem>>, vector<8x32xf32>
    tpu.vector_store %arg16[%113, %c0_66], %110 {strides = array<i32>} : memref<64x32xf32, #tpu.memory_space<vmem>>, vector<8x32xf32>,
    %c6_i32 = arith.constant 6 : i32
    %c8_i32_67 = arith.constant 8 : i32
    %115 = arith.muli %c6_i32, %c8_i32_67 : i32
    %116 = tpu.assume_multiple %115, 8 : i32
    %c7_i32_68 = arith.constant 7 : i32
    %117 = arith.subi %c7_i32_68, %c6_i32 : i32
    %c8_i32_69 = arith.constant 8 : i32
    %118 = arith.muli %117, %c8_i32_69 : i32
    %119 = tpu.assume_multiple %118, 8 : i32
    %120 = arith.index_cast %116 : i32 to index
    %c0_70 = arith.constant 0 : index
    %121 = vector.load %arg13[%120, %c0_70] : memref<64x32xf32, #tpu.memory_space<vmem>>, vector<8x32xf32>
    %cst_71 = arith.constant dense<0.000000e+00> : vector<8x32xf32>
    %122 = tpu.matmul %105, %0, %cst_71 {dimension_numbers = #tpu.dot_dimension_numbers<[1], [0], [0], [1], [0, 0, 1, 1], [], []>} : vector<8x32xf32>, vector<32x32xf32>, vector<8x32xf32> -> vector<8x32xf32>
    %123 = arith.addf %121, %122 : vector<8x32xf32>
    %124 = math.tanh %123 : vector<8x32xf32>
    %125 = arith.index_cast %119 : i32 to index
    %c0_72 = arith.constant 0 : index
    %126 = vector.load %arg14[%125, %c0_72] : memref<64x32xf32, #tpu.memory_space<vmem>>, vector<8x32xf32>
    %cst_73 = arith.constant dense<0.000000e+00> : vector<8x32xf32>
    %127 = tpu.matmul %110, %1, %cst_73 {dimension_numbers = #tpu.dot_dimension_numbers<[1], [0], [0], [1], [0, 0, 1, 1], [], []>} : vector<8x32xf32>, vector<32x32xf32>, vector<8x32xf32> -> vector<8x32xf32>
    %128 = arith.addf %126, %127 : vector<8x32xf32>
    %129 = math.tanh %128 : vector<8x32xf32>
    %130 = arith.index_cast %116 : i32 to index
    %c0_74 = arith.constant 0 : index
    %131 = vector.load %arg15[%130, %c0_74] : memref<64x32xf32, #tpu.memory_space<vmem>>, vector<8x32xf32>
    tpu.vector_store %arg15[%130, %c0_74], %124 {strides = array<i32>} : memref<64x32xf32, #tpu.memory_space<vmem>>, vector<8x32xf32>,
    %132 = arith.index_cast %119 : i32 to index
    %c0_75 = arith.constant 0 : index
    %133 = vector.load %arg16[%132, %c0_75] : memref<64x32xf32, #tpu.memory_space<vmem>>, vector<8x32xf32>
    tpu.vector_store %arg16[%132, %c0_75], %129 {strides = array<i32>} : memref<64x32xf32, #tpu.memory_space<vmem>>, vector<8x32xf32>,
    %c7_i32_76 = arith.constant 7 : i32
    %c8_i32_77 = arith.constant 8 : i32
    %134 = arith.muli %c7_i32_76, %c8_i32_77 : i32
    %135 = tpu.assume_multiple %134, 8 : i32
    %c7_i32_78 = arith.constant 7 : i32
    %136 = arith.subi %c7_i32_78, %c7_i32_76 : i32
    %c8_i32_79 = arith.constant 8 : i32
    %137 = arith.muli %136, %c8_i32_79 : i32
    %138 = tpu.assume_multiple %137, 8 : i32
    %139 = arith.index_cast %135 : i32 to index
    %c0_80 = arith.constant 0 : index
    %140 = vector.load %arg13[%139, %c0_80] : memref<64x32xf32, #tpu.memory_space<vmem>>, vector<8x32xf32>
    %cst_81 = arith.constant dense<0.000000e+00> : vector<8x32xf32>
    %141 = tpu.matmul %124, %0, %cst_81 {dimension_numbers = #tpu.dot_dimension_numbers<[1], [0], [0], [1], [0, 0, 1, 1], [], []>} : vector<8x32xf32>, vector<32x32xf32>, vector<8x32xf32> -> vector<8x32xf32>
    %142 = arith.addf %140, %141 : vector<8x32xf32>
    %143 = math.tanh %142 : vector<8x32xf32>
    %144 = arith.index_cast %138 : i32 to index
    %c0_82 = arith.constant 0 : index
    %145 = vector.load %arg14[%144, %c0_82] : memref<64x32xf32, #tpu.memory_space<vmem>>, vector<8x32xf32>
    %cst_83 = arith.constant dense<0.000000e+00> : vector<8x32xf32>
    %146 = tpu.matmul %129, %1, %cst_83 {dimension_numbers = #tpu.dot_dimension_numbers<[1], [0], [0], [1], [0, 0, 1, 1], [], []>} : vector<8x32xf32>, vector<32x32xf32>, vector<8x32xf32> -> vector<8x32xf32>
    %147 = arith.addf %145, %146 : vector<8x32xf32>
    %148 = math.tanh %147 : vector<8x32xf32>
    %149 = arith.index_cast %135 : i32 to index
    %c0_84 = arith.constant 0 : index
    %150 = vector.load %arg15[%149, %c0_84] : memref<64x32xf32, #tpu.memory_space<vmem>>, vector<8x32xf32>
    tpu.vector_store %arg15[%149, %c0_84], %143 {strides = array<i32>} : memref<64x32xf32, #tpu.memory_space<vmem>>, vector<8x32xf32>,
    %151 = arith.index_cast %138 : i32 to index
    %c0_85 = arith.constant 0 : index
    %152 = vector.load %arg16[%151, %c0_85] : memref<64x32xf32, #tpu.memory_space<vmem>>, vector<8x32xf32>
    tpu.vector_store %arg16[%151, %c0_85], %148 {strides = array<i32>} : memref<64x32xf32, #tpu.memory_space<vmem>>, vector<8x32xf32>,
    %c7_i32_86 = arith.constant 7 : i32
    %c0_87 = arith.constant 0 : index
    %c0_88 = arith.constant 0 : index
    %153 = vector.load %arg15[%c0_87, %c0_88] : memref<64x32xf32, #tpu.memory_space<vmem>>, vector<64x32xf32>
    %c0_89 = arith.constant 0 : index
    %c0_90 = arith.constant 0 : index
    %154 = vector.load %arg5[%c0_89, %c0_90] : memref<32x64xf32, #tpu.memory_space<vmem>>, vector<32x64xf32>
    %cst_91 = arith.constant dense<0.000000e+00> : vector<64x64xf32>
    %155 = tpu.matmul %153, %154, %cst_91 {dimension_numbers = #tpu.dot_dimension_numbers<[1], [0], [0], [1], [0, 0, 1, 1], [], []>} : vector<64x32xf32>, vector<32x64xf32>, vector<64x64xf32> -> vector<64x64xf32>
    %c0_92 = arith.constant 0 : index
    %c0_93 = arith.constant 0 : index
    %156 = vector.load %arg16[%c0_92, %c0_93] : memref<64x32xf32, #tpu.memory_space<vmem>>, vector<64x32xf32>
    %c0_94 = arith.constant 0 : index
    %c0_95 = arith.constant 0 : index
    %157 = vector.load %arg6[%c0_94, %c0_95] : memref<32x64xf32, #tpu.memory_space<vmem>>, vector<32x64xf32>
    %cst_96 = arith.constant dense<0.000000e+00> : vector<64x64xf32>
    %158 = tpu.matmul %156, %157, %cst_96 {dimension_numbers = #tpu.dot_dimension_numbers<[1], [0], [0], [1], [0, 0, 1, 1], [], []>} : vector<64x32xf32>, vector<32x64xf32>, vector<64x64xf32> -> vector<64x64xf32>
    %159 = arith.addf %155, %158 : vector<64x64xf32>
    %c0_97 = arith.constant 0 : index
    %c0_98 = arith.constant 0 : index
    %160 = vector.load %arg7[%c0_97, %c0_98] : memref<1x64xf32, #tpu.memory_space<vmem>>, vector<1x64xf32>
    %161 = vector.broadcast %160 : vector<1x64xf32> to vector<64x64xf32>
    %162 = arith.addf %159, %161 : vector<64x64xf32>
    %163 = vector.extract_strided_slice %162 {offsets = [0, 0], sizes = [64, 32], strides = [1, 1]} : vector<64x64xf32> to vector<64x32xf32>
    %c0_99 = arith.constant 0 : index
    %c0_100 = arith.constant 0 : index
    %164 = vector.load %arg13[%c0_99, %c0_100] : memref<64x32xf32, #tpu.memory_space<vmem>>, vector<64x32xf32>
    tpu.vector_store %arg13[%c0_99, %c0_100], %163 {strides = array<i32>} : memref<64x32xf32, #tpu.memory_space<vmem>>, vector<64x32xf32>,
    %165 = vector.extract_strided_slice %162 {offsets = [0, 32], sizes = [64, 32], strides = [1, 1]} : vector<64x64xf32> to vector<64x32xf32>
    %c0_101 = arith.constant 0 : index
    %c0_102 = arith.constant 0 : index
    %166 = vector.load %arg14[%c0_101, %c0_102] : memref<64x32xf32, #tpu.memory_space<vmem>>, vector<64x32xf32>
    tpu.vector_store %arg14[%c0_101, %c0_102], %165 {strides = array<i32>} : memref<64x32xf32, #tpu.memory_space<vmem>>, vector<64x32xf32>,
    %c0_103 = arith.constant 0 : index
    %c0_104 = arith.constant 0 : index
    %167 = vector.load %arg13[%c0_103, %c0_104] : memref<64x32xf32, #tpu.memory_space<vmem>>, vector<8x32xf32>
    %168 = math.tanh %167 : vector<8x32xf32>
    %c56_105 = arith.constant 56 : index
    %c0_106 = arith.constant 0 : index
    %169 = vector.load %arg14[%c56_105, %c0_106] : memref<64x32xf32, #tpu.memory_space<vmem>>, vector<8x32xf32>
    %170 = math.tanh %169 : vector<8x32xf32>
    %c1_i32_107 = arith.constant 1 : i32
    %c8_i32_108 = arith.constant 8 : i32
    %171 = arith.muli %c1_i32_107, %c8_i32_108 : i32
    %172 = tpu.assume_multiple %171, 8 : i32
    %c7_i32_109 = arith.constant 7 : i32
    %173 = arith.subi %c7_i32_109, %c1_i32_107 : i32
    %c8_i32_110 = arith.constant 8 : i32
    %174 = arith.muli %173, %c8_i32_110 : i32
    %175 = tpu.assume_multiple %174, 8 : i32
    %176 = arith.index_cast %172 : i32 to index
    %c0_111 = arith.constant 0 : index
    %177 = vector.load %arg13[%176, %c0_111] : memref<64x32xf32, #tpu.memory_space<vmem>>, vector<8x32xf32>
    %cst_112 = arith.constant dense<0.000000e+00> : vector<8x32xf32>
    %178 = tpu.matmul %168, %2, %cst_112 {dimension_numbers = #tpu.dot_dimension_numbers<[1], [0], [0], [1], [0, 0, 1, 1], [], []>} : vector<8x32xf32>, vector<32x32xf32>, vector<8x32xf32> -> vector<8x32xf32>
    %179 = arith.addf %177, %178 : vector<8x32xf32>
    %180 = math.tanh %179 : vector<8x32xf32>
    %181 = arith.index_cast %175 : i32 to index
    %c0_113 = arith.constant 0 : index
    %182 = vector.load %arg14[%181, %c0_113] : memref<64x32xf32, #tpu.memory_space<vmem>>, vector<8x32xf32>
    %cst_114 = arith.constant dense<0.000000e+00> : vector<8x32xf32>
    %183 = tpu.matmul %170, %3, %cst_114 {dimension_numbers = #tpu.dot_dimension_numbers<[1], [0], [0], [1], [0, 0, 1, 1], [], []>} : vector<8x32xf32>, vector<32x32xf32>, vector<8x32xf32> -> vector<8x32xf32>
    %184 = arith.addf %182, %183 : vector<8x32xf32>
    %185 = math.tanh %184 : vector<8x32xf32>
    %c2_i32_115 = arith.constant 2 : i32
    %c8_i32_116 = arith.constant 8 : i32
    %186 = arith.muli %c2_i32_115, %c8_i32_116 : i32
    %187 = tpu.assume_multiple %186, 8 : i32
    %c7_i32_117 = arith.constant 7 : i32
    %188 = arith.subi %c7_i32_117, %c2_i32_115 : i32
    %c8_i32_118 = arith.constant 8 : i32
    %189 = arith.muli %188, %c8_i32_118 : i32
    %190 = tpu.assume_multiple %189, 8 : i32
    %191 = arith.index_cast %187 : i32 to index
    %c0_119 = arith.constant 0 : index
    %192 = vector.load %arg13[%191, %c0_119] : memref<64x32xf32, #tpu.memory_space<vmem>>, vector<8x32xf32>
    %cst_120 = arith.constant dense<0.000000e+00> : vector<8x32xf32>
    %193 = tpu.matmul %180, %2, %cst_120 {dimension_numbers = #tpu.dot_dimension_numbers<[1], [0], [0], [1], [0, 0, 1, 1], [], []>} : vector<8x32xf32>, vector<32x32xf32>, vector<8x32xf32> -> vector<8x32xf32>
    %194 = arith.addf %192, %193 : vector<8x32xf32>
    %195 = math.tanh %194 : vector<8x32xf32>
    %196 = arith.index_cast %190 : i32 to index
    %c0_121 = arith.constant 0 : index
    %197 = vector.load %arg14[%196, %c0_121] : memref<64x32xf32, #tpu.memory_space<vmem>>, vector<8x32xf32>
    %cst_122 = arith.constant dense<0.000000e+00> : vector<8x32xf32>
    %198 = tpu.matmul %185, %3, %cst_122 {dimension_numbers = #tpu.dot_dimension_numbers<[1], [0], [0], [1], [0, 0, 1, 1], [], []>} : vector<8x32xf32>, vector<32x32xf32>, vector<8x32xf32> -> vector<8x32xf32>
    %199 = arith.addf %197, %198 : vector<8x32xf32>
    %200 = math.tanh %199 : vector<8x32xf32>
    %c3_i32_123 = arith.constant 3 : i32
    %c8_i32_124 = arith.constant 8 : i32
    %201 = arith.muli %c3_i32_123, %c8_i32_124 : i32
    %202 = tpu.assume_multiple %201, 8 : i32
    %c7_i32_125 = arith.constant 7 : i32
    %203 = arith.subi %c7_i32_125, %c3_i32_123 : i32
    %c8_i32_126 = arith.constant 8 : i32
    %204 = arith.muli %203, %c8_i32_126 : i32
    %205 = tpu.assume_multiple %204, 8 : i32
    %206 = arith.index_cast %202 : i32 to index
    %c0_127 = arith.constant 0 : index
    %207 = vector.load %arg13[%206, %c0_127] : memref<64x32xf32, #tpu.memory_space<vmem>>, vector<8x32xf32>
    %cst_128 = arith.constant dense<0.000000e+00> : vector<8x32xf32>
    %208 = tpu.matmul %195, %2, %cst_128 {dimension_numbers = #tpu.dot_dimension_numbers<[1], [0], [0], [1], [0, 0, 1, 1], [], []>} : vector<8x32xf32>, vector<32x32xf32>, vector<8x32xf32> -> vector<8x32xf32>
    %209 = arith.addf %207, %208 : vector<8x32xf32>
    %210 = math.tanh %209 : vector<8x32xf32>
    %211 = arith.index_cast %205 : i32 to index
    %c0_129 = arith.constant 0 : index
    %212 = vector.load %arg14[%211, %c0_129] : memref<64x32xf32, #tpu.memory_space<vmem>>, vector<8x32xf32>
    %cst_130 = arith.constant dense<0.000000e+00> : vector<8x32xf32>
    %213 = tpu.matmul %200, %3, %cst_130 {dimension_numbers = #tpu.dot_dimension_numbers<[1], [0], [0], [1], [0, 0, 1, 1], [], []>} : vector<8x32xf32>, vector<32x32xf32>, vector<8x32xf32> -> vector<8x32xf32>
    %214 = arith.addf %212, %213 : vector<8x32xf32>
    %215 = math.tanh %214 : vector<8x32xf32>
    %c4_i32_131 = arith.constant 4 : i32
    %c8_i32_132 = arith.constant 8 : i32
    %216 = arith.muli %c4_i32_131, %c8_i32_132 : i32
    %217 = tpu.assume_multiple %216, 8 : i32
    %c7_i32_133 = arith.constant 7 : i32
    %218 = arith.subi %c7_i32_133, %c4_i32_131 : i32
    %c8_i32_134 = arith.constant 8 : i32
    %219 = arith.muli %218, %c8_i32_134 : i32
    %220 = tpu.assume_multiple %219, 8 : i32
    %221 = arith.index_cast %217 : i32 to index
    %c0_135 = arith.constant 0 : index
    %222 = vector.load %arg13[%221, %c0_135] : memref<64x32xf32, #tpu.memory_space<vmem>>, vector<8x32xf32>
    %cst_136 = arith.constant dense<0.000000e+00> : vector<8x32xf32>
    %223 = tpu.matmul %210, %2, %cst_136 {dimension_numbers = #tpu.dot_dimension_numbers<[1], [0], [0], [1], [0, 0, 1, 1], [], []>} : vector<8x32xf32>, vector<32x32xf32>, vector<8x32xf32> -> vector<8x32xf32>
    %224 = arith.addf %222, %223 : vector<8x32xf32>
    %225 = math.tanh %224 : vector<8x32xf32>
    %226 = arith.index_cast %220 : i32 to index
    %c0_137 = arith.constant 0 : index
    %227 = vector.load %arg14[%226, %c0_137] : memref<64x32xf32, #tpu.memory_space<vmem>>, vector<8x32xf32>
    %cst_138 = arith.constant dense<0.000000e+00> : vector<8x32xf32>
    %228 = tpu.matmul %215, %3, %cst_138 {dimension_numbers = #tpu.dot_dimension_numbers<[1], [0], [0], [1], [0, 0, 1, 1], [], []>} : vector<8x32xf32>, vector<32x32xf32>, vector<8x32xf32> -> vector<8x32xf32>
    %229 = arith.addf %227, %228 : vector<8x32xf32>
    %230 = math.tanh %229 : vector<8x32xf32>
    %c5_i32_139 = arith.constant 5 : i32
    %c8_i32_140 = arith.constant 8 : i32
    %231 = arith.muli %c5_i32_139, %c8_i32_140 : i32
    %232 = tpu.assume_multiple %231, 8 : i32
    %c7_i32_141 = arith.constant 7 : i32
    %233 = arith.subi %c7_i32_141, %c5_i32_139 : i32
    %c8_i32_142 = arith.constant 8 : i32
    %234 = arith.muli %233, %c8_i32_142 : i32
    %235 = tpu.assume_multiple %234, 8 : i32
    %236 = arith.index_cast %232 : i32 to index
    %c0_143 = arith.constant 0 : index
    %237 = vector.load %arg13[%236, %c0_143] : memref<64x32xf32, #tpu.memory_space<vmem>>, vector<8x32xf32>
    %cst_144 = arith.constant dense<0.000000e+00> : vector<8x32xf32>
    %238 = tpu.matmul %225, %2, %cst_144 {dimension_numbers = #tpu.dot_dimension_numbers<[1], [0], [0], [1], [0, 0, 1, 1], [], []>} : vector<8x32xf32>, vector<32x32xf32>, vector<8x32xf32> -> vector<8x32xf32>
    %239 = arith.addf %237, %238 : vector<8x32xf32>
    %240 = math.tanh %239 : vector<8x32xf32>
    %241 = arith.index_cast %235 : i32 to index
    %c0_145 = arith.constant 0 : index
    %242 = vector.load %arg14[%241, %c0_145] : memref<64x32xf32, #tpu.memory_space<vmem>>, vector<8x32xf32>
    %cst_146 = arith.constant dense<0.000000e+00> : vector<8x32xf32>
    %243 = tpu.matmul %230, %3, %cst_146 {dimension_numbers = #tpu.dot_dimension_numbers<[1], [0], [0], [1], [0, 0, 1, 1], [], []>} : vector<8x32xf32>, vector<32x32xf32>, vector<8x32xf32> -> vector<8x32xf32>
    %244 = arith.addf %242, %243 : vector<8x32xf32>
    %245 = math.tanh %244 : vector<8x32xf32>
    %c6_i32_147 = arith.constant 6 : i32
    %c8_i32_148 = arith.constant 8 : i32
    %246 = arith.muli %c6_i32_147, %c8_i32_148 : i32
    %247 = tpu.assume_multiple %246, 8 : i32
    %c7_i32_149 = arith.constant 7 : i32
    %248 = arith.subi %c7_i32_149, %c6_i32_147 : i32
    %c8_i32_150 = arith.constant 8 : i32
    %249 = arith.muli %248, %c8_i32_150 : i32
    %250 = tpu.assume_multiple %249, 8 : i32
    %251 = arith.index_cast %247 : i32 to index
    %c0_151 = arith.constant 0 : index
    %252 = vector.load %arg13[%251, %c0_151] : memref<64x32xf32, #tpu.memory_space<vmem>>, vector<8x32xf32>
    %cst_152 = arith.constant dense<0.000000e+00> : vector<8x32xf32>
    %253 = tpu.matmul %240, %2, %cst_152 {dimension_numbers = #tpu.dot_dimension_numbers<[1], [0], [0], [1], [0, 0, 1, 1], [], []>} : vector<8x32xf32>, vector<32x32xf32>, vector<8x32xf32> -> vector<8x32xf32>
    %254 = arith.addf %252, %253 : vector<8x32xf32>
    %255 = math.tanh %254 : vector<8x32xf32>
    %256 = arith.index_cast %250 : i32 to index
    %c0_153 = arith.constant 0 : index
    %257 = vector.load %arg14[%256, %c0_153] : memref<64x32xf32, #tpu.memory_space<vmem>>, vector<8x32xf32>
    %cst_154 = arith.constant dense<0.000000e+00> : vector<8x32xf32>
    %258 = tpu.matmul %245, %3, %cst_154 {dimension_numbers = #tpu.dot_dimension_numbers<[1], [0], [0], [1], [0, 0, 1, 1], [], []>} : vector<8x32xf32>, vector<32x32xf32>, vector<8x32xf32> -> vector<8x32xf32>
    %259 = arith.addf %257, %258 : vector<8x32xf32>
    %260 = math.tanh %259 : vector<8x32xf32>
    %c7_i32_155 = arith.constant 7 : i32
    %c8_i32_156 = arith.constant 8 : i32
    %261 = arith.muli %c7_i32_155, %c8_i32_156 : i32
    %262 = tpu.assume_multiple %261, 8 : i32
    %c7_i32_157 = arith.constant 7 : i32
    %263 = arith.subi %c7_i32_157, %c7_i32_155 : i32
    %c8_i32_158 = arith.constant 8 : i32
    %264 = arith.muli %263, %c8_i32_158 : i32
    %265 = tpu.assume_multiple %264, 8 : i32
    %266 = arith.index_cast %262 : i32 to index
    %c0_159 = arith.constant 0 : index
    %267 = vector.load %arg13[%266, %c0_159] : memref<64x32xf32, #tpu.memory_space<vmem>>, vector<8x32xf32>
    %cst_160 = arith.constant dense<0.000000e+00> : vector<8x32xf32>
    %268 = tpu.matmul %255, %2, %cst_160 {dimension_numbers = #tpu.dot_dimension_numbers<[1], [0], [0], [1], [0, 0, 1, 1], [], []>} : vector<8x32xf32>, vector<32x32xf32>, vector<8x32xf32> -> vector<8x32xf32>
    %269 = arith.addf %267, %268 : vector<8x32xf32>
    %270 = math.tanh %269 : vector<8x32xf32>
    %271 = arith.index_cast %265 : i32 to index
    %c0_161 = arith.constant 0 : index
    %272 = vector.load %arg14[%271, %c0_161] : memref<64x32xf32, #tpu.memory_space<vmem>>, vector<8x32xf32>
    %cst_162 = arith.constant dense<0.000000e+00> : vector<8x32xf32>
    %273 = tpu.matmul %260, %3, %cst_162 {dimension_numbers = #tpu.dot_dimension_numbers<[1], [0], [0], [1], [0, 0, 1, 1], [], []>} : vector<8x32xf32>, vector<32x32xf32>, vector<8x32xf32> -> vector<8x32xf32>
    %274 = arith.addf %272, %273 : vector<8x32xf32>
    %275 = math.tanh %274 : vector<8x32xf32>
    %c7_i32_163 = arith.constant 7 : i32
    %276 = tpu.concatenate %143, %148, %270, %275 in 1 : vector<8x32xf32>, vector<8x32xf32>, vector<8x32xf32>, vector<8x32xf32> -> vector<8x128xf32>
    %c0_164 = arith.constant 0 : index
    %c0_165 = arith.constant 0 : index
    %277 = vector.load %arg10[%c0_164, %c0_165] : memref<128x128xf32, #tpu.memory_space<vmem>>, vector<128x128xf32>
    %cst_166 = arith.constant dense<0.000000e+00> : vector<8x128xf32>
    %278 = tpu.matmul %276, %277, %cst_166 {dimension_numbers = #tpu.dot_dimension_numbers<[1], [0], [0], [1], [0, 0, 1, 1], [], []>} : vector<8x128xf32>, vector<128x128xf32>, vector<8x128xf32> -> vector<8x128xf32>
    %c0_167 = arith.constant 0 : index
    %c0_168 = arith.constant 0 : index
    %279 = vector.load %arg11[%c0_167, %c0_168] : memref<1x128xf32, #tpu.memory_space<vmem>>, vector<1x128xf32>
    %280 = vector.broadcast %279 : vector<1x128xf32> to vector<8x128xf32>
    %281 = arith.addf %278, %280 : vector<8x128xf32>
    %c0_169 = arith.constant 0 : index
    %c0_170 = arith.constant 0 : index
    %282 = vector.load %arg12[%c0_169, %c0_170] : memref<8x128xf32, #tpu.memory_space<vmem>>, vector<8x128xf32>
    tpu.vector_store %arg12[%c0_169, %c0_170], %281 {strides = array<i32>} : memref<8x128xf32, #tpu.memory_space<vmem>>, vector<8x128xf32>,
    return
  }
}

</mosaic_0001>

<bundles_post_ra>
// kernel: rnn_classifier_forward.1
= control target key start
LH: loop header
LB: loop body
LE: loop exit
PB: predicated region body
PF: predicated region fallthrough
CT: control target
= control target key end

     0   :  { %vm76_vm0 = vcmask 261120   ;;  %v3612_v12 = vmov 0.0   ;;  %vm3613_vm1 = vmmov 0   ;;  %s3616_s14 = smov 64   ;;  %vm2790_vm2 = vcmask 523264   ;;  %s4306_s1 = inlined_call_operand.vmem [shape: f32[32,64], index: 1, kind: input, shape index: {}]   ;;  %s4307_s0 = inlined_call_operand.vmem [shape: f32[64,32], index: 0, kind: input, shape index: {}]   ;;  %s4308_s3 = inlined_call_operand.vmem [shape: f32[32,32], index: 3, kind: input, shape index: {}]   ;;  %s4309_s2 = inlined_call_operand.vmem [shape: f32[1,64], index: 2, kind: input, shape index: {}]   ;;  %s4310_s4 = inlined_call_operand.vmem [shape: f32[32,32], index: 4, kind: input, shape index: {}]   ;;  %s4311_s5 = inlined_call_operand.vmem [shape: f32[32,64], index: 5, kind: input, shape index: {}]   ;;  %s4312_s6 = inlined_call_operand.vmem [shape: f32[32,64], index: 6, kind: input, shape index: {}]   ;;  %s4313_s8 = inlined_call_operand.vmem [shape: f32[32,32], index: 8, kind: input, shape index: {}]   ;;  %s4314_s7 = inlined_call_operand.vmem [shape: f32[1,64], index: 7, kind: input, shape index: {}]   ;;  %s4315_s9 = inlined_call_operand.vmem [shape: f32[32,32], index: 9, kind: input, shape index: {}]   ;;  %s4316_s10 = inlined_call_operand.vmem [shape: f32[128,128], index: 10, kind: input, shape index: {}]   ;;  %s4317_s11 = inlined_call_operand.vmem [shape: f32[1,128], index: 11, kind: input, shape index: {}]   ;;  %s4318_s12 = inlined_call_operand.vmem [shape: f32[8,128], index: 12, kind: output, shape index: {}]  }
   0x1   :  { %v68_v0 = vld [vmem:[%s4306_s1 + $0x18] sm:$0xff]  ;;  %v67_v1 = vld [vmem:[%s4306_s1 + $0x10] sm:$0xff]  ;;  %v57_v2 = vld [vmem:[%s4307_s0] sm:$0xff]  ;;  %3182 = vmatprep.subr.mxu0 %v3612_v12  ;;  %3190 = vmatprep.mubr.msk.f32.mxu0 %vm3613_vm1, %v3612_v12  ;;  %vm2792_vm3 = vcmask 785408  }
   0x2   :  { %3140 = vmatprep.subr.mxu1 %v68_v0  ;;  %v66_v3 = vld [vmem:[%s4306_s1 + $0x8] sm:$0xff]  ;;  %3148 = vmatprep.mubr.msk.f32.mxu1 %vm76_vm0, %v57_v2  ;;  %v65_v4 = vld [vmem:[%s4306_s1] sm:$0xff]  ;;  %v59_v6 = vld [vmem:[%s4307_s0 + $0x10] sm:$0xff] }
   0x3   :  { %3141 = vmatpush3.msra.mxu1 %v68_v0  ;;  %v58_v5 = vld [vmem:[%s4307_s0 + $0x8] sm:$0xff]  ;;  %v60_v7 = vld [vmem:[%s4307_s0 + $0x18] sm:$0xff]  ;;  %v61_v8 = vld [vmem:[%s4307_s0 + $0x20] sm:$0xff] }
   0x4   :  { %3142 = vmatprep.subr.mxu1 %v67_v1  ;;  %v62_v9 = vld [vmem:[%s4307_s0 + $0x28] sm:$0xff]  ;;  %v63_v10 = vld [vmem:[%s4307_s0 + $0x30] sm:$0xff]  ;;  %v64_v11 = vld [vmem:[%s4307_s0 + $0x38] sm:$0xff] }
   0x5   :  { %3143 = vmatpush3.msra.mxu1 %v67_v1  ;;  %v3730_v13 = vld [vmem:[%s4308_s3 + $0x18] sm:$0xff]  ;;  %v3739_v14 = vld [vmem:[%s4308_s3 + $0x10] sm:$0xff]  ;;  %v3748_v15 = vld [vmem:[%s4308_s3 + $0x8] sm:$0xff] }
   0x6   :  { %3144 = vmatprep.subr.mxu1 %v66_v3  ;;  %3183 = vmatpush3.msra.mxu0 %v3730_v13  ;;  %v3757_v16 = vld [vmem:[%s4308_s3] sm:$0xff]  ;;  %v3789_v35 = vld [vmem:[%s4310_s4 + $0x18] sm:$0xff]  ;;  %v3797_v37 = vld [vmem:[%s4310_s4 + $0x10] sm:$0xff] }
   0x7   :  { %3145 = vmatpush3.msra.mxu1 %v66_v3  ;;  %3184 = vmatprep.subr.mxu0 %v3612_v12  ;;  %v2892_v17 = vld [vmem:[%s4309_s2] ss:$0 sm:$0xff]  ;;  %s3614_s2 = smov 96   ;;  %v3806_v38 = vld [vmem:[%s4310_s4 + $0x8] sm:$0xff] }
   0x8   :  { %3146 = vmatprep.subr.mxu1 %v65_v4  ;;  %3185 = vmatpush3.msra.mxu0 %v3739_v14  ;;  %v3813_v39 = vld [vmem:[%s4310_s4] sm:$0xff] }
   0x9   :  { %3147 = vmatpush3.msra.mxu1 %v65_v4  ;;  %3186 = vmatprep.subr.mxu0 %v3612_v12 }
   0xa   :  { %3149 = vmatmul.mubr.msk.f32.vlgmr.msra.gmra.mxu1 %vm76_vm0, %v58_v5  ;;  %3160 = vmatprep.subr.mxu1 %v3612_v12 }
   0xb   :  { %3151 = vmatprep.mubr.msk.f32.mxu1 %vm76_vm0, %v59_v6  ;;  %3161 = vmatpush3.msra.mxu1 %v3730_v13 }
   0xc   :  { %3162 = vmatprep.subr.mxu1 %v3612_v12  ;;  %3187 = vmatpush3.msra.mxu0 %v3748_v15 }
   0xd   :  { %3163 = vmatpush3.msra.mxu1 %v3739_v14  ;;  %3188 = vmatprep.subr.mxu0 %v3612_v12 }
   0xe   :  { %3152 = vmatmul.mubr.msk.f32.gmra.mxu1 %vm76_vm0, %v60_v7  ;;  %3164 = vmatprep.subr.mxu1 %v3612_v12 }
   0xf   :  { %3154 = vmatprep.mubr.msk.f32.mxu1 %vm76_vm0, %v61_v8  ;;  %3165 = vmatpush3.msra.mxu1 %v3748_v15 }
  0x10   :  { %3166 = vmatprep.subr.mxu1 %v3612_v12  ;;  %3189 = vmatpush3.msra.mxu0 %v3757_v16 }
  0x11   :  { %3167 = vmatpush3.msra.mxu1 %v3757_v16  ;;  %3204 = vmatprep.subr.mxu0 %v3612_v12 }
  0x12   :  { %3155 = vmatmul.mubr.msk.f32.gmra.mxu1 %vm76_vm0, %v62_v9  ;;  %3171 = vmatprep.subr.mxu1 %v3612_v12 }
  0x13   :  { %3157 = vmatprep.mubr.msk.f32.mxu1 %vm76_vm0, %v63_v10 }
  0x16   :  { %3158 = vmatmul.mubr.msk.f32.gmra.mxu1 %vm76_vm0, %v64_v11 }
  0x17   :  { %3168 = vmatprep.mubr.msk.f32.mxu1 %vm3613_vm1, %v3612_v12 }
  0xca   :  { %v3150_v18 = vpop.f32.mrf.mxu1 }
  0xcb   :  { %v173_v19 = vadd.f32 %v3150_v18, %v2892_v17 }
  0xcc   :  { %v167_v20 = vpop.f32.mrf.mxu1 }
  0xcd   :  { %207 = vst.msk [vmem:[#allocation2 + $0x8] sm:$0xff] %vm76_vm0, %v173_v19  ;;  %v168_v21 = vadd.f32 %v2892_v17, %v167_v20 }
  0xce   :  { %v3153_v22 = vpop.f32.mrf.mxu1 }
  0xcf   :  { %206 = vst.msk [vmem:[#allocation2] sm:$0xff] %vm76_vm0, %v168_v21  ;;  %v183_v23 = vadd.f32 %v3153_v22, %v2892_v17 }
  0xd0   :  { %v177_v24 = vpop.f32.mrf.mxu1 }
  0xd1   :  { %209 = vst.msk [vmem:[#allocation2 + $0x18] sm:$0xff] %vm76_vm0, %v183_v23  ;;  %v178_v25 = vadd.f32 %v2892_v17, %v177_v24 }
  0xd2   :  { %v3156_v26 = vpop.f32.mrf.mxu1 }
  0xd3   :  { %208 = vst.msk [vmem:[#allocation2 + $0x10] sm:$0xff] %vm76_vm0, %v178_v25  ;;  %v193_v27 = vadd.f32 %v3156_v26, %v2892_v17 }
  0xd4   :  { %v187_v28 = vpop.f32.mrf.mxu1  ;;  %v261_v50 = vld [vmem:[#allocation2 + $0x8] sm:$0xff] }
  0xd5   :  { %211 = vst.msk [vmem:[#allocation2 + $0x28] sm:$0xff] %vm76_vm0, %v193_v27  ;;  %v188_v29 = vadd.f32 %v2892_v17, %v187_v28  ;;  %232 = vrot.lane.b32.xlu1 %v193_v27, %s3614_s2 }
  0xd6   :  { %v254_v30 = vld [vmem:[#allocation2] sm:$0xff]  ;;  %v3159_v31 = vpop.f32.mrf.mxu1 }
  0xd7   :  { %3548 = vtanh.f32 %v254_v30  ;;  %210 = vst.msk [vmem:[#allocation2 + $0x20] sm:$0xff] %vm76_vm0, %v188_v29  ;;  %v203_v32 = vadd.f32 %v3159_v31, %v2892_v17 }
  0xd8   :  { %v197_v33 = vpop.f32.mrf.mxu1  ;;  %v577_v6 = vld [vmem:[#allocation2 + $0x18] sm:$0xff] }
  0xd9   :  { %213 = vst.msk [vmem:[#allocation2 + $0x38] sm:$0xff] %vm76_vm0, %v203_v32  ;;  %v198_v34 = vadd.f32 %v2892_v17, %v197_v33  ;;  %236 = vrot.lane.b32.xlu0 %v203_v32, %s3614_s2  ;;  %230 = vrot.lane.b32.xlu1 %v188_v29, %s3614_s2 }
  0xda   :  { %v419_v60 = vld [vmem:[#allocation2 + $0x10] sm:$0xff] }
  0xdb   :  { %212 = vst.msk [vmem:[#allocation2 + $0x30] sm:$0xff] %vm76_vm0, %v198_v34 }
  0xdc   :  { %v893_v31 = vld [vmem:[#allocation2 + $0x28] sm:$0xff] }
  0xdd   :  { %234 = vrot.lane.b32.xlu0 %v198_v34, %s3614_s2  ;;  %226 = vrot.lane.b32.xlu1 %v178_v25, %s3614_s2 }
  0xe1   :  { %228 = vrot.lane.b32.xlu0 %v183_v23, %s3614_s2  ;;  %222 = vrot.lane.b32.xlu1 %v168_v21, %s3614_s2  ;;  %v735_v21 = vld [vmem:[#allocation2 + $0x20] sm:$0xff] }
  0xe4   :  { %v3549_v36 = vpop.eup %3548 }
  0xe5   :  { %258 = vst.msk [vmem:[#allocation4] sm:$0xff] %vm76_vm0, %v3549_v36  ;;  %224 = vrot.lane.b32.xlu0 %v173_v19, %s3614_s2  ;;  %3169 = vmatmul.mubr.msk.f32.vlgmr.msra.gmra.mxu1 %vm76_vm0, %v3549_v36 }
  0xe6   :  { %3172 = vmatpush3.msra.mxu1 %v3789_v35  ;;  %3179 = vmatprep.mubr.msk.f32.mxu1 %vm3613_vm1, %v3612_v12 }
  0xe7   :  { %3173 = vmatprep.subr.mxu1 %v3612_v12 }
  0xe8   :  { %3174 = vmatpush3.msra.mxu1 %v3797_v37 }
  0xe9   :  { %3175 = vmatprep.subr.mxu1 %v3612_v12 }
  0xea   :  { %3176 = vmatpush3.msra.mxu1 %v3806_v38 }
  0xeb   :  { %3177 = vmatprep.subr.mxu1 %v3612_v12 }
  0xec   :  { %3178 = vmatpush3.msra.mxu1 %v3813_v39 }
  0xed   :  { %3193 = vmatprep.subr.mxu1 %v3612_v12 }
 0x147   :  { %v233_v40 = vpop.permute.xlu1 %232 }
 0x148   :  { %251 = vst.msk [vmem:[#allocation3 + $0x28] sm:$0xff] %vm76_vm0, %v233_v40 }
 0x14b   :  { %v237_v41 = vpop.permute.xlu0 %236  ;;  %v231_v42 = vpop.permute.xlu1 %230 }
 0x14c   :  { %253 = vst.msk [vmem:[#allocation3 + $0x38] sm:$0xff] %vm76_vm0, %v237_v41  ;;  %250 = vst.msk [vmem:[#allocation3 + $0x20] sm:$0xff] %vm76_vm0, %v231_v42 }
 0x14f   :  { %v235_v43 = vpop.permute.xlu0 %234  ;;  %v227_v44 = vpop.permute.xlu1 %226  ;;  %v496_v1 = vld [vmem:[#allocation3 + $0x28] sm:$0xff] }
 0x150   :  { %252 = vst.msk [vmem:[#allocation3 + $0x30] sm:$0xff] %vm76_vm0, %v235_v43  ;;  %248 = vst.msk [vmem:[#allocation3 + $0x10] sm:$0xff] %vm76_vm0, %v227_v44 }
 0x153   :  { %v256_v45 = vld [vmem:[#allocation3 + $0x38] sm:$0xff]  ;;  %v229_v46 = vpop.permute.xlu0 %228  ;;  %v223_v47 = vpop.permute.xlu1 %222  ;;  %v654_v11 = vld [vmem:[#allocation3 + $0x20] sm:$0xff] }
 0x154   :  { %3550 = vtanh.f32 %v256_v45  ;;  %249 = vst.msk [vmem:[#allocation3 + $0x18] sm:$0xff] %vm76_vm0, %v229_v46  ;;  %246 = vst.msk [vmem:[#allocation3] sm:$0xff] %vm76_vm0, %v223_v47 }
 0x157   :  { %v225_v48 = vpop.permute.xlu0 %224  ;;  %v338_v55 = vld [vmem:[#allocation3 + $0x30] sm:$0xff] }
 0x158   :  { %247 = vst.msk [vmem:[#allocation3 + $0x8] sm:$0xff] %vm76_vm0, %v225_v48  ;;  %v970_v40 = vld [vmem:[#allocation3 + $0x10] sm:$0xff] }
 0x159   :  { %v1374_v48 = vld [vmem:[%s4311_s5 + $0x10] sm:$0xff] }
 0x15b   :  { %v812_v26 = vld [vmem:[#allocation3 + $0x18] sm:$0xff] }
 0x161   :  { %v3551_v49 = vpop.eup %3550 }
 0x162   :  { %259 = vst.msk [vmem:[#allocation5 + $0x38] sm:$0xff] %vm76_vm0, %v3551_v49  ;;  %3180 = vmatmul.mubr.msk.f32.vlgmr.msra.gmra.mxu1 %vm76_vm0, %v3551_v49  ;;  %v1364_v49 = vld [vmem:[#allocation4] sm:$0xff] }
 0x163   :  { %3194 = vmatpush3.msra.mxu1 %v3789_v35  ;;  %3201 = vmatprep.mubr.msk.f32.mxu1 %vm3613_vm1, %v3612_v12 }
 0x164   :  { %3195 = vmatprep.subr.mxu1 %v3612_v12 }
 0x165   :  { %3196 = vmatpush3.msra.mxu1 %v3797_v37 }
 0x166   :  { %3197 = vmatprep.subr.mxu1 %v3612_v12 }
 0x167   :  { %3198 = vmatpush3.msra.mxu1 %v3806_v38 }
 0x168   :  { %3199 = vmatprep.subr.mxu1 %v3612_v12 }
 0x169   :  { %3200 = vmatpush3.msra.mxu1 %v3813_v39 }
 0x16a   :  { %3215 = vmatprep.subr.mxu1 %v3612_v12 }
 0x1a5   :  { %v331_v51 = vpop.f32.mrf.mxu1 }
 0x1a6   :  { %v335_v52 = vadd.f32 %v331_v51, %v261_v50  ;;  %v1373_v50 = vld [vmem:[%s4311_s5 + $0x8] sm:$0xff]  ;;  %v1372_v51 = vld [vmem:[%s4311_s5] sm:$0xff] }
 0x1a7   :  { %v3170_v53 = vpop.f32.mrf.mxu1 }
 0x1a8   :  { %3552 = vtanh.f32 %v335_v52 }
 0x1b5   :  { %v3553_v54 = vpop.eup %3552 }
 0x1b6   :  { %415 = vst.msk [vmem:[#allocation4 + $0x8] sm:$0xff] %vm76_vm0, %v3553_v54  ;;  %3191 = vmatmul.mubr.msk.f32.vlgmr.msra.gmra.mxu0 %vm76_vm0, %v3553_v54 }
 0x1b7   :  { %3205 = vmatpush3.msra.mxu0 %v3730_v13  ;;  %3212 = vmatprep.mubr.msk.f32.mxu0 %vm3613_vm1, %v3612_v12 }
 0x1b8   :  { %3206 = vmatprep.subr.mxu0 %v3612_v12 }
 0x1b9   :  { %3207 = vmatpush3.msra.mxu0 %v3739_v14 }
 0x1ba   :  { %3208 = vmatprep.subr.mxu0 %v3612_v12 }
 0x1bb   :  { %3209 = vmatpush3.msra.mxu0 %v3748_v15 }
 0x1bc   :  { %3210 = vmatprep.subr.mxu0 %v3612_v12 }
 0x1bd   :  { %3211 = vmatpush3.msra.mxu0 %v3757_v16  ;;  %v1365_v52 = vld [vmem:[#allocation4 + $0x8] sm:$0xff] }
 0x1be   :  { %3226 = vmatprep.subr.mxu0 %v3612_v12 }
 0x222   :  { %v408_v56 = vpop.f32.mrf.mxu1 }
 0x223   :  { %v412_v57 = vadd.f32 %v408_v56, %v338_v55 }
 0x224   :  { %v3181_v58 = vpop.f32.mrf.mxu1 }
 0x225   :  { %3554 = vtanh.f32 %v412_v57  ;;  %v1209_v58 = vld [vmem:[#allocation2 + $0x38] sm:$0xff] }
 0x232   :  { %v3555_v59 = vpop.eup %3554 }
 0x233   :  { %417 = vst.msk [vmem:[#allocation5 + $0x30] sm:$0xff] %vm76_vm0, %v3555_v59  ;;  %3202 = vmatmul.mubr.msk.f32.vlgmr.msra.gmra.mxu1 %vm76_vm0, %v3555_v59 }
 0x234   :  { %3216 = vmatpush3.msra.mxu1 %v3789_v35  ;;  %3223 = vmatprep.mubr.msk.f32.mxu1 %vm3613_vm1, %v3612_v12 }
 0x235   :  { %3217 = vmatprep.subr.mxu1 %v3612_v12 }
 0x236   :  { %3218 = vmatpush3.msra.mxu1 %v3797_v37 }
 0x237   :  { %3219 = vmatprep.subr.mxu1 %v3612_v12 }
 0x238   :  { %3220 = vmatpush3.msra.mxu1 %v3806_v38 }
 0x239   :  { %3221 = vmatprep.subr.mxu1 %v3612_v12 }
 0x23a   :  { %3222 = vmatpush3.msra.mxu1 %v3813_v39 }
 0x23b   :  { %3237 = vmatprep.subr.mxu1 %v3612_v12 }
 0x276   :  { %v489_v61 = vpop.f32.mrf.mxu0 }
 0x277   :  { %v493_v62 = vadd.f32 %v489_v61, %v419_v60 }
 0x278   :  { %v3192_v63 = vpop.f32.mrf.mxu0 }
 0x279   :  { %3556 = vtanh.f32 %v493_v62  ;;  %v1387_v62 = vld [vmem:[%s4312_s6 + $0x18] sm:$0xff]  ;;  %v1386_v63 = vld [vmem:[%s4312_s6 + $0x10] sm:$0xff] }
 0x286   :  { %v3557_v0 = vpop.eup %3556 }
 0x287   :  { %573 = vst.msk [vmem:[#allocation4 + $0x10] sm:$0xff] %vm76_vm0, %v3557_v0  ;;  %3213 = vmatmul.mubr.msk.f32.vlgmr.msra.gmra.mxu0 %vm76_vm0, %v3557_v0 }
 0x288   :  { %3227 = vmatpush3.msra.mxu0 %v3730_v13  ;;  %3234 = vmatprep.mubr.msk.f32.mxu0 %vm3613_vm1, %v3612_v12 }
 0x289   :  { %3228 = vmatprep.subr.mxu0 %v3612_v12 }
 0x28a   :  { %3229 = vmatpush3.msra.mxu0 %v3739_v14 }
 0x28b   :  { %3230 = vmatprep.subr.mxu0 %v3612_v12 }
 0x28c   :  { %3231 = vmatpush3.msra.mxu0 %v3748_v15 }
 0x28d   :  { %3232 = vmatprep.subr.mxu0 %v3612_v12 }
 0x28e   :  { %3233 = vmatpush3.msra.mxu0 %v3757_v16  ;;  %v1366_v53 = vld [vmem:[#allocation4 + $0x10] sm:$0xff] }
 0x28f   :  { %3248 = vmatprep.subr.mxu0 %v3612_v12 }
 0x2f3   :  { %v566_v2 = vpop.f32.mrf.mxu1 }
 0x2f4   :  { %v570_v3 = vadd.f32 %v566_v2, %v496_v1  ;;  %v1385_v1 = vld [vmem:[%s4312_s6 + $0x8] sm:$0xff]  ;;  %v1384_v2 = vld [vmem:[%s4312_s6] sm:$0xff] }
 0x2f5   :  { %v3203_v4 = vpop.f32.mrf.mxu1 }
 0x2f6   :  { %3558 = vtanh.f32 %v570_v3  ;;  %v1285_v4 = vld [vmem:[#allocation3] sm:$0xff] }
 0x303   :  { %v3559_v5 = vpop.eup %3558 }
 0x304   :  { %575 = vst.msk [vmem:[#allocation5 + $0x28] sm:$0xff] %vm76_vm0, %v3559_v5  ;;  %3224 = vmatmul.mubr.msk.f32.vlgmr.msra.gmra.mxu1 %vm76_vm0, %v3559_v5 }
 0x305   :  { %3238 = vmatpush3.msra.mxu1 %v3789_v35  ;;  %3245 = vmatprep.mubr.msk.f32.mxu1 %vm3613_vm1, %v3612_v12 }
 0x306   :  { %3239 = vmatprep.subr.mxu1 %v3612_v12 }
 0x307   :  { %3240 = vmatpush3.msra.mxu1 %v3797_v37 }
 0x308   :  { %3241 = vmatprep.subr.mxu1 %v3612_v12 }
 0x309   :  { %3242 = vmatpush3.msra.mxu1 %v3806_v38 }
 0x30a   :  { %3243 = vmatprep.subr.mxu1 %v3612_v12 }
 0x30b   :  { %3244 = vmatpush3.msra.mxu1 %v3813_v39 }
 0x30c   :  { %3259 = vmatprep.subr.mxu1 %v3612_v12 }
 0x347   :  { %v647_v7 = vpop.f32.mrf.mxu0 }
 0x348   :  { %v651_v8 = vadd.f32 %v647_v7, %v577_v6 }
 0x349   :  { %v3214_v9 = vpop.f32.mrf.mxu0 }
 0x34a   :  { %3560 = vtanh.f32 %v651_v8 }
 0x357   :  { %v3561_v10 = vpop.eup %3560 }
 0x358   :  { %731 = vst.msk [vmem:[#allocation4 + $0x18] sm:$0xff] %vm76_vm0, %v3561_v10  ;;  %3235 = vmatmul.mubr.msk.f32.vlgmr.msra.gmra.mxu0 %vm76_vm0, %v3561_v10 }
 0x359   :  { %3249 = vmatpush3.msra.mxu0 %v3730_v13  ;;  %3256 = vmatprep.mubr.msk.f32.mxu0 %vm3613_vm1, %v3612_v12 }
 0x35a   :  { %3250 = vmatprep.subr.mxu0 %v3612_v12 }
 0x35b   :  { %3251 = vmatpush3.msra.mxu0 %v3739_v14 }
 0x35c   :  { %3252 = vmatprep.subr.mxu0 %v3612_v12 }
 0x35d   :  { %3253 = vmatpush3.msra.mxu0 %v3748_v15 }
 0x35e   :  { %3254 = vmatprep.subr.mxu0 %v3612_v12 }
 0x35f   :  { %3255 = vmatpush3.msra.mxu0 %v3757_v16  ;;  %v1367_v54 = vld [vmem:[#allocation4 + $0x18] sm:$0xff] }
 0x360   :  { %3270 = vmatprep.subr.mxu0 %v3612_v12 }
 0x3c4   :  { %v724_v17 = vpop.f32.mrf.mxu1 }
 0x3c5   :  { %v728_v18 = vadd.f32 %v724_v17, %v654_v11 }
 0x3c6   :  { %v3225_v19 = vpop.f32.mrf.mxu1 }
 0x3c7   :  { %3562 = vtanh.f32 %v728_v18  ;;  %v1381_v19 = vld [vmem:[#allocation5 + $0x28] sm:$0xff] }
 0x3d4   :  { %v3563_v20 = vpop.eup %3562 }
 0x3d5   :  { %733 = vst.msk [vmem:[#allocation5 + $0x20] sm:$0xff] %vm76_vm0, %v3563_v20  ;;  %3246 = vmatmul.mubr.msk.f32.vlgmr.msra.gmra.mxu1 %vm76_vm0, %v3563_v20  ;;  %v1382_v20 = vld [vmem:[#allocation5 + $0x30] sm:$0xff] }
 0x3d6   :  { %3260 = vmatpush3.msra.mxu1 %v3789_v35  ;;  %3267 = vmatprep.mubr.msk.f32.mxu1 %vm3613_vm1, %v3612_v12 }
 0x3d7   :  { %3261 = vmatprep.subr.mxu1 %v3612_v12 }
 0x3d8   :  { %3262 = vmatpush3.msra.mxu1 %v3797_v37 }
 0x3d9   :  { %3263 = vmatprep.subr.mxu1 %v3612_v12 }
 0x3da   :  { %3264 = vmatpush3.msra.mxu1 %v3806_v38 }
 0x3db   :  { %3265 = vmatprep.subr.mxu1 %v3612_v12 }
 0x3dc   :  { %3266 = vmatpush3.msra.mxu1 %v3813_v39  ;;  %v1380_v18 = vld [vmem:[#allocation5 + $0x20] sm:$0xff] }
 0x3dd   :  { %3281 = vmatprep.subr.mxu1 %v3612_v12 }
 0x418   :  { %v805_v22 = vpop.f32.mrf.mxu0 }
 0x419   :  { %v809_v23 = vadd.f32 %v805_v22, %v735_v21  ;;  %v1383_v21 = vld [vmem:[#allocation5 + $0x38] sm:$0xff] }
 0x41a   :  { %v3236_v24 = vpop.f32.mrf.mxu0  ;;  %v4018_v22 = vld [vmem:[%s4313_s8 + $0x18] sm:$0xff] }
 0x41b   :  { %3564 = vtanh.f32 %v809_v23  ;;  %v4024_v23 = vld [vmem:[%s4313_s8 + $0x10] sm:$0xff]  ;;  %v4031_v24 = vld [vmem:[%s4313_s8 + $0x8] sm:$0xff] }
 0x428   :  { %v3565_v25 = vpop.eup %3564 }
 0x429   :  { %889 = vst.msk [vmem:[#allocation4 + $0x20] sm:$0xff] %vm76_vm0, %v3565_v25  ;;  %3257 = vmatmul.mubr.msk.f32.vlgmr.msra.gmra.mxu0 %vm76_vm0, %v3565_v25  ;;  %v4038_v25 = vld [vmem:[%s4313_s8] sm:$0xff] }
 0x42a   :  { %3271 = vmatpush3.msra.mxu0 %v3730_v13  ;;  %3278 = vmatprep.mubr.msk.f32.mxu0 %vm3613_vm1, %v3612_v12 }
 0x42b   :  { %3272 = vmatprep.subr.mxu0 %v3612_v12 }
 0x42c   :  { %3273 = vmatpush3.msra.mxu0 %v3739_v14 }
 0x42d   :  { %3274 = vmatprep.subr.mxu0 %v3612_v12 }
 0x42e   :  { %3275 = vmatpush3.msra.mxu0 %v3748_v15 }
 0x42f   :  { %3276 = vmatprep.subr.mxu0 %v3612_v12 }
 0x430   :  { %3277 = vmatpush3.msra.mxu0 %v3757_v16  ;;  %v1368_v55 = vld [vmem:[#allocation4 + $0x20] sm:$0xff] }
 0x431   :  { %3292 = vmatprep.subr.mxu0 %v3612_v12 }
 0x495   :  { %v882_v27 = vpop.f32.mrf.mxu1 }
 0x496   :  { %v886_v28 = vadd.f32 %v882_v27, %v812_v26 }
 0x497   :  { %v3247_v29 = vpop.f32.mrf.mxu1 }
 0x498   :  { %3566 = vtanh.f32 %v886_v28 }
 0x4a5   :  { %v3567_v30 = vpop.eup %3566 }
 0x4a6   :  { %891 = vst.msk [vmem:[#allocation5 + $0x18] sm:$0xff] %vm76_vm0, %v3567_v30  ;;  %3268 = vmatmul.mubr.msk.f32.vlgmr.msra.gmra.mxu1 %vm76_vm0, %v3567_v30 }
 0x4a7   :  { %3282 = vmatpush3.msra.mxu1 %v3789_v35  ;;  %3289 = vmatprep.mubr.msk.f32.mxu1 %vm3613_vm1, %v3612_v12 }
 0x4a8   :  { %3283 = vmatprep.subr.mxu1 %v3612_v12 }
 0x4a9   :  { %3284 = vmatpush3.msra.mxu1 %v3797_v37 }
 0x4aa   :  { %3285 = vmatprep.subr.mxu1 %v3612_v12 }
 0x4ab   :  { %3286 = vmatpush3.msra.mxu1 %v3806_v38 }
 0x4ac   :  { %3287 = vmatprep.subr.mxu1 %v3612_v12 }
 0x4ad   :  { %3288 = vmatpush3.msra.mxu1 %v3813_v39  ;;  %v1379_v17 = vld [vmem:[#allocation5 + $0x18] sm:$0xff] }
 0x4ae   :  { %3303 = vmatprep.subr.mxu1 %v3612_v12 }
 0x4e9   :  { %v963_v32 = vpop.f32.mrf.mxu0 }
 0x4ea   :  { %v967_v33 = vadd.f32 %v963_v32, %v893_v31  ;;  %v2931_v31 = vld [vmem:[%s4314_s7] ss:$0 sm:$0xff] }
 0x4eb   :  { %v3258_v34 = vpop.f32.mrf.mxu0 }
 0x4ec   :  { %3568 = vtanh.f32 %v967_v33 }
 0x4f9   :  { %v3569_v36 = vpop.eup %3568 }
 0x4fa   :  { %1047 = vst.msk [vmem:[#allocation4 + $0x28] sm:$0xff] %vm76_vm0, %v3569_v36  ;;  %3279 = vmatmul.mubr.msk.f32.vlgmr.msra.gmra.mxu0 %vm76_vm0, %v3569_v36 }
 0x4fb   :  { %3293 = vmatpush3.msra.mxu0 %v3730_v13  ;;  %3300 = vmatprep.mubr.msk.f32.mxu0 %vm3613_vm1, %v3612_v12 }
 0x4fc   :  { %3294 = vmatprep.subr.mxu0 %v3612_v12 }
 0x4fd   :  { %3295 = vmatpush3.msra.mxu0 %v3739_v14  ;;  %v1051_v14 = vld [vmem:[#allocation2 + $0x30] sm:$0xff] }
 0x4fe   :  { %3296 = vmatprep.subr.mxu0 %v3612_v12 }
 0x4ff   :  { %3297 = vmatpush3.msra.mxu0 %v3748_v15 }
 0x500   :  { %3298 = vmatprep.subr.mxu0 %v3612_v12 }
 0x501   :  { %3299 = vmatpush3.msra.mxu0 %v3757_v16  ;;  %v1369_v56 = vld [vmem:[#allocation4 + $0x28] sm:$0xff] }
 0x502   :  { %3314 = vmatprep.subr.mxu0 %v1387_v62 }
 0x566   :  { %v1040_v41 = vpop.f32.mrf.mxu1 }
 0x567   :  { %v1044_v42 = vadd.f32 %v1040_v41, %v970_v40 }
 0x568   :  { %v3269_v43 = vpop.f32.mrf.mxu1 }
 0x569   :  { %3570 = vtanh.f32 %v1044_v42 }
 0x576   :  { %v3571_v13 = vpop.eup %3570 }
 0x577   :  { %1049 = vst.msk [vmem:[#allocation5 + $0x10] sm:$0xff] %vm76_vm0, %v3571_v13  ;;  %3290 = vmatmul.mubr.msk.f32.vlgmr.msra.gmra.mxu1 %vm76_vm0, %v3571_v13 }
 0x578   :  { %3304 = vmatpush3.msra.mxu1 %v3789_v35  ;;  %3311 = vmatprep.mubr.msk.f32.mxu1 %vm3613_vm1, %v3612_v12  ;;  %v1375_v35 = vld [vmem:[%s4311_s5 + $0x18] sm:$0xff] }
 0x579   :  { %3305 = vmatprep.subr.mxu1 %v3612_v12 }
 0x57a   :  { %3306 = vmatpush3.msra.mxu1 %v3797_v37  ;;  %v1128_v37 = vld [vmem:[#allocation3 + $0x8] sm:$0xff] }
 0x57b   :  { %3307 = vmatprep.subr.mxu1 %v3612_v12 }
 0x57c   :  { %3308 = vmatpush3.msra.mxu1 %v3806_v38 }
 0x57d   :  { %3309 = vmatprep.subr.mxu1 %v3612_v12 }
 0x57e   :  { %3310 = vmatpush3.msra.mxu1 %v3813_v39  ;;  %v1378_v11 = vld [vmem:[#allocation5 + $0x10] sm:$0xff] }
 0x57f   :  { %3334 = vmatprep.subr.mxu1 %v1375_v35 }
 0x5ba   :  { %v1121_v15 = vpop.f32.mrf.mxu0 }
 0x5bb   :  { %v1125_v16 = vadd.f32 %v1121_v15, %v1051_v14 }
 0x5bc   :  { %v3280_v44 = vpop.f32.mrf.mxu0 }
 0x5bd   :  { %3572 = vtanh.f32 %v1125_v16 }
 0x5ca   :  { %v3573_v45 = vpop.eup %3572 }
 0x5cb   :  { %1205 = vst.msk [vmem:[#allocation4 + $0x30] sm:$0xff] %vm76_vm0, %v3573_v45  ;;  %3301 = vmatmul.mubr.msk.f32.vlgmr.msra.gmra.mxu0 %vm76_vm0, %v3573_v45 }
 0x5cc   :  { %3315 = vmatpush3.msra.mxu0 %v1387_v62 }
 0x5cd   :  { %3316 = vmatprep.subr.mxu0 %v1386_v63 }
 0x5ce   :  { %3317 = vmatpush3.msra.mxu0 %v1386_v63 }
 0x5cf   :  { %3318 = vmatprep.subr.mxu0 %v1385_v1 }
 0x5d0   :  { %3319 = vmatpush3.msra.mxu0 %v1385_v1 }
 0x5d1   :  { %3320 = vmatprep.subr.mxu0 %v1384_v2 }
 0x5d2   :  { %v1370_v57 = vld [vmem:[#allocation4 + $0x30] sm:$0xff]  ;;  %3321 = vmatpush3.msra.mxu0 %v1384_v2 }
 0x5d3   :  { %3354 = vmatprep.subr.mxu0 %v3612_v12 }
 0x637   :  { %v1198_v38 = vpop.f32.mrf.mxu1 }
 0x638   :  { %v1202_v46 = vadd.f32 %v1198_v38, %v1128_v37 }
 0x639   :  { %v3291_v47 = vpop.f32.mrf.mxu1 }
 0x63a   :  { %3574 = vtanh.f32 %v1202_v46 }
 0x647   :  { %v3575_v39 = vpop.eup %3574 }
 0x648   :  { %1207 = vst.msk [vmem:[#allocation5 + $0x8] sm:$0xff] %vm76_vm0, %v3575_v39  ;;  %3312 = vmatmul.mubr.msk.f32.vlgmr.msra.gmra.mxu1 %vm76_vm0, %v3575_v39 }
 0x649   :  { %3335 = vmatpush3.msra.mxu1 %v1375_v35  ;;  %3342 = vmatprep.mubr.msk.f32.mxu1 %vm76_vm0, %v1364_v49 }
 0x64a   :  { %3336 = vmatprep.subr.mxu1 %v1374_v48 }
 0x64b   :  { %3337 = vmatpush3.msra.mxu1 %v1374_v48 }
 0x64c   :  { %3338 = vmatprep.subr.mxu1 %v1373_v50 }
 0x64d   :  { %3339 = vmatpush3.msra.mxu1 %v1373_v50  ;;  %v4054_v50 = vld [vmem:[%s4315_s9 + $0x18] sm:$0xff] }
 0x64e   :  { %3340 = vmatprep.subr.mxu1 %v1372_v51 }
 0x64f   :  { %3341 = vmatpush3.msra.mxu1 %v1372_v51  ;;  %v1377_v10 = vld [vmem:[#allocation5 + $0x8] sm:$0xff] }
 0x650   :  { %3343 = vmatmul.mubr.msk.f32.vlgmr.msra.gmra.mxu1 %vm76_vm0, %v1365_v52  ;;  %3365 = vmatprep.subr.mxu1 %v3612_v12 }
 0x651   :  { %3345 = vmatprep.mubr.msk.f32.mxu1 %vm76_vm0, %v1366_v53  ;;  %3366 = vmatpush3.msra.mxu1 %v4054_v50 }
 0x652   :  { %3367 = vmatprep.subr.mxu1 %v3612_v12 }
 0x654   :  { %3346 = vmatmul.mubr.msk.f32.gmra.mxu1 %vm76_vm0, %v1367_v54  ;;  %v4060_v54 = vld [vmem:[%s4315_s9 + $0x10] sm:$0xff] }
 0x655   :  { %3348 = vmatprep.mubr.msk.f32.mxu1 %vm76_vm0, %v1368_v55  ;;  %3368 = vmatpush3.msra.mxu1 %v4060_v54 }
 0x656   :  { %3369 = vmatprep.subr.mxu1 %v3612_v12 }
 0x658   :  { %3349 = vmatmul.mubr.msk.f32.gmra.mxu1 %vm76_vm0, %v1369_v56 }
 0x659   :  { %3351 = vmatprep.mubr.msk.f32.mxu1 %vm76_vm0, %v1370_v57 }
 0x68b   :  { %v1279_v59 = vpop.f32.mrf.mxu0 }
 0x68c   :  { %v1283_v60 = vadd.f32 %v1279_v59, %v1209_v58  ;;  %v4071_v58 = vld [vmem:[%s4315_s9 + $0x8] sm:$0xff]  ;;  %v4080_v59 = vld [vmem:[%s4315_s9] sm:$0xff]  ;;  %s3615_s9 = smov 32  }
 0x68d   :  { %v3302_v61 = vpop.f32.mrf.mxu0  ;;  %3370 = vmatpush3.msra.mxu1 %v4071_v58 }
 0x68e   :  { %3576 = vtanh.f32 %v1283_v60  ;;  %3371 = vmatprep.subr.mxu1 %v3612_v12 }
 0x68f   :  { %3372 = vmatpush3.msra.mxu1 %v4080_v59 }
 0x690   :  { %3387 = vmatprep.subr.mxu1 %v3612_v12 }
 0x69b   :  { %v3987_v0 = vpop.eup %3576 }
 0x69c   :  { %1362 = vst.msk [vmem:[#allocation4 + $0x38] sm:$0xff] %vm76_vm0, %v3987_v0 }
 0x6a3   :  { %v1371_v3 = vld [vmem:[#allocation4 + $0x38] sm:$0xff] }
 0x6a4   :  { %3352 = vmatmul.mubr.msk.f32.gmra.mxu1 %vm76_vm0, %v1371_v3 }
 0x6a5   :  { %3373 = vmatprep.mubr.msk.f32.mxu1 %vm3613_vm1, %v3612_v12 }
 0x708   :  { %v1355_v5 = vpop.f32.mrf.mxu1 }
 0x709   :  { %v1359_v6 = vadd.f32 %v1355_v5, %v1285_v4 }
 0x70a   :  { %v3313_v7 = vpop.f32.mrf.mxu1 }
 0x70b   :  { %3578 = vtanh.f32 %v1359_v6 }
 0x710   :  { %v3344_v26 = vpop.f32.mrf.mxu1 }
 0x712   :  { %v1607_v27 = vpop.f32.mrf.mxu1 }
 0x714   :  { %v3347_v28 = vpop.f32.mrf.mxu1 }
 0x716   :  { %v1617_v29 = vpop.f32.mrf.mxu1 }
 0x718   :  { %v4001_v8 = vpop.eup %3578  ;;  %v3350_v40 = vpop.f32.mrf.mxu1 }
 0x719   :  { %1363 = vst.msk [vmem:[#allocation5] sm:$0xff] %vm76_vm0, %v4001_v8 }
 0x71a   :  { %v1627_v16 = vpop.f32.mrf.mxu1 }
 0x720   :  { %v1376_v9 = vld [vmem:[#allocation5] sm:$0xff] }
 0x721   :  { %3322 = vmatprep.mubr.msk.f32.mxu0 %vm76_vm0, %v1376_v9 }
 0x722   :  { %3323 = vmatmul.mubr.msk.f32.vlgmr.msra.gmra.mxu0 %vm76_vm0, %v1377_v10 }
 0x723   :  { %3325 = vmatprep.mubr.msk.f32.mxu0 %vm76_vm0, %v1378_v11  ;;  %3355 = vmatpush3.msra.mxu0 %v4018_v22 }
 0x724   :  { %3356 = vmatprep.subr.mxu0 %v3612_v12 }
 0x725   :  { %3357 = vmatpush3.msra.mxu0 %v4024_v23 }
 0x726   :  { %3326 = vmatmul.mubr.msk.f32.gmra.mxu0 %vm76_vm0, %v1379_v17  ;;  %3358 = vmatprep.subr.mxu0 %v3612_v12 }
 0x727   :  { %3328 = vmatprep.mubr.msk.f32.mxu0 %vm76_vm0, %v1380_v18  ;;  %3359 = vmatpush3.msra.mxu0 %v4031_v24 }
 0x728   :  { %3360 = vmatprep.subr.mxu0 %v3612_v12 }
 0x729   :  { %3361 = vmatpush3.msra.mxu0 %v4038_v25 }
 0x72a   :  { %3329 = vmatmul.mubr.msk.f32.gmra.mxu0 %vm76_vm0, %v1381_v19  ;;  %3376 = vmatprep.subr.mxu0 %v3612_v12 }
 0x72b   :  { %3331 = vmatprep.mubr.msk.f32.mxu0 %vm76_vm0, %v1382_v20 }
 0x72e   :  { %3332 = vmatmul.mubr.msk.f32.gmra.mxu0 %vm76_vm0, %v1383_v21 }
 0x72f   :  { %3362 = vmatprep.mubr.msk.f32.mxu0 %vm3613_vm1, %v3612_v12 }
 0x764   :  { %v3353_v37 = vpop.f32.mrf.mxu1 }
 0x766   :  { %v1637_v51 = vpop.f32.mrf.mxu1 }
 0x7e2   :  { %v3324_v30 = vpop.f32.mrf.mxu0 }
 0x7e3   :  { %v1613_v32 = vadd.f32 %v3344_v26, %v3324_v30 }
 0x7e4   :  { %v1478_v33 = vpop.f32.mrf.mxu0 }
 0x7e5   :  { %v1654_v34 = vadd.f32 %v2931_v31, %v1613_v32  ;;  %v1608_v36 = vadd.f32 %v1607_v27, %v1478_v33 }
 0x7e6   :  { %v3327_v41 = vpop.f32.mrf.mxu0 }
 0x7e7   :  { %1662 = vst.msk [vmem:[#allocation2 + $0x8] sm:$0xff] %vm76_vm0, %v1654_v34  ;;  %v1653_v42 = vadd.f32 %v2931_v31, %v1608_v36  ;;  %v1623_v43 = vadd.f32 %v3347_v28, %v3327_v41 }
 0x7e8   :  { %v1488_v13 = vpop.f32.mrf.mxu0 }
 0x7e9   :  { %1661 = vst.msk [vmem:[#allocation2] sm:$0xff] %vm76_vm0, %v1653_v42  ;;  %v1656_v14 = vadd.f32 %v2931_v31, %v1623_v43  ;;  %v1618_v15 = vadd.f32 %v1617_v29, %v1488_v13 }
 0x7ea   :  { %v3330_v44 = vpop.f32.mrf.mxu0 }
 0x7eb   :  { %1664 = vst.msk [vmem:[#allocation2 + $0x18] sm:$0xff] %vm76_vm0, %v1656_v14  ;;  %v1655_v35 = vadd.f32 %v2931_v31, %v1618_v15  ;;  %v1633_v45 = vadd.f32 %v3350_v40, %v3330_v44 }
 0x7ec   :  { %v1498_v38 = vpop.f32.mrf.mxu0 }
 0x7ed   :  { %1663 = vst.msk [vmem:[#allocation2 + $0x10] sm:$0xff] %vm76_vm0, %v1655_v35  ;;  %v1658_v46 = vadd.f32 %v2931_v31, %v1633_v45  ;;  %v1628_v47 = vadd.f32 %v1627_v16, %v1498_v38 }
 0x7ee   :  { %v3333_v39 = vpop.f32.mrf.mxu0 }
 0x7ef   :  { %1666 = vst.msk [vmem:[#allocation2 + $0x28] sm:$0xff] %vm76_vm0, %v1658_v46  ;;  %v1657_v48 = vadd.f32 %v2931_v31, %v1628_v47  ;;  %v1643_v49 = vadd.f32 %v3353_v37, %v3333_v39 }
 0x7f0   :  { %v1709_v52 = vld [vmem:[#allocation2] sm:$0xff]  ;;  %v1508_v53 = vpop.f32.mrf.mxu0 }
 0x7f1   :  { %3580 = vtanh.f32 %v1709_v52  ;;  %1665 = vst.msk [vmem:[#allocation2 + $0x20] sm:$0xff] %vm76_vm0, %v1657_v48  ;;  %v1660_v55 = vadd.f32 %v2931_v31, %v1643_v49  ;;  %v1638_v56 = vadd.f32 %v1637_v51, %v1508_v53 }
 0x7f2   :  { %v2017_v41 = vld [vmem:[#allocation2 + $0x18] sm:$0xff] }
 0x7f3   :  { %1668 = vst.msk [vmem:[#allocation2 + $0x38] sm:$0xff] %vm76_vm0, %v1660_v55  ;;  %v1659_v57 = vadd.f32 %v2931_v31, %v1638_v56  ;;  %1691 = vrot.lane.b32.xlu0 %v1660_v55, %s3614_s2 }
 0x7f4   :  { %v1865_v27 = vld [vmem:[#allocation2 + $0x10] sm:$0xff] }
 0x7f5   :  { %1667 = vst.msk [vmem:[#allocation2 + $0x30] sm:$0xff] %vm76_vm0, %v1659_v57  ;;  %1689 = vrot.lane.b32.xlu1 %v1659_v57, %s3614_s2 }
 0x7f6   :  { %v2321_v55 = vld [vmem:[#allocation2 + $0x28] sm:$0xff] }
 0x7f7   :  { %1687 = vrot.lane.b32.xlu0 %v1658_v46, %s3614_s2 }
 0x7f8   :  { %v2169_v37 = vld [vmem:[#allocation2 + $0x20] sm:$0xff] }
 0x7f9   :  { %1685 = vrot.lane.b32.xlu1 %v1657_v48, %s3614_s2 }
 0x7fb   :  { %1683 = vrot.lane.b32.xlu0 %v1656_v14, %s3614_s2 }
 0x7fd   :  { %1681 = vrot.lane.b32.xlu1 %v1655_v35, %s3614_s2 }
 0x7fe   :  { %v3581_v60 = vpop.eup %3580 }
 0x7ff   :  { %1679 = vrot.lane.b32.xlu0 %v1654_v34, %s3614_s2  ;;  %3363 = vmatmul.mubr.msk.f32.vlgmr.msra.gmra.mxu0 %vm76_vm0, %v3581_v60 }
 0x800   :  { %3377 = vmatpush3.msra.mxu0 %v4018_v22  ;;  %3384 = vmatprep.mubr.msk.f32.mxu0 %vm3613_vm1, %v3612_v12 }
 0x801   :  { %1677 = vrot.lane.b32.xlu1 %v1653_v42, %s3614_s2  ;;  %3378 = vmatprep.subr.mxu0 %v3612_v12 }
 0x802   :  { %3379 = vmatpush3.msra.mxu0 %v4024_v23 }
 0x803   :  { %2778 = vrot.lane.b32.xlu0 %v4001_v8, %s3615_s9  ;;  %3380 = vmatprep.subr.mxu0 %v3612_v12  ;;  %v1713_v8 = vld [vmem:[#allocation2 + $0x8] sm:$0xff] }
 0x804   :  { %3381 = vmatpush3.msra.mxu0 %v4031_v24 }
 0x805   :  { %3382 = vmatprep.subr.mxu0 %v3612_v12 }
 0x806   :  { %3383 = vmatpush3.msra.mxu0 %v4038_v25 }
 0x807   :  { %3398 = vmatprep.subr.mxu0 %v3612_v12 }
 0x865   :  { %v1692_v61 = vpop.permute.xlu0 %1691 }
 0x866   :  { %1708 = vst.msk [vmem:[#allocation3 + $0x38] sm:$0xff] %vm76_vm0, %v1692_v61 }
 0x867   :  { %v1690_v62 = vpop.permute.xlu1 %1689 }
 0x868   :  { %1707 = vst.msk [vmem:[#allocation3 + $0x30] sm:$0xff] %vm76_vm0, %v1690_v62 }
 0x869   :  { %v1688_v63 = vpop.permute.xlu0 %1687 }
 0x86a   :  { %1706 = vst.msk [vmem:[#allocation3 + $0x28] sm:$0xff] %vm76_vm0, %v1688_v63 }
 0x86b   :  { %v1686_v1 = vpop.permute.xlu1 %1685 }
 0x86c   :  { %1705 = vst.msk [vmem:[#allocation3 + $0x20] sm:$0xff] %vm76_vm0, %v1686_v1 }
 0x86d   :  { %v1711_v2 = vld [vmem:[#allocation3 + $0x38] sm:$0xff]  ;;  %v1684_v3 = vpop.permute.xlu0 %1683 }
 0x86e   :  { %3582 = vtanh.f32 %v1711_v2  ;;  %1704 = vst.msk [vmem:[#allocation3 + $0x18] sm:$0xff] %vm76_vm0, %v1684_v3 }
 0x86f   :  { %v1682_v4 = vpop.permute.xlu1 %1681  ;;  %v1789_v18 = vld [vmem:[#allocation3 + $0x30] sm:$0xff] }
 0x870   :  { %1703 = vst.msk [vmem:[#allocation3 + $0x10] sm:$0xff] %vm76_vm0, %v1682_v4 }
 0x871   :  { %v1680_v5 = vpop.permute.xlu0 %1679  ;;  %v1941_v32 = vld [vmem:[#allocation3 + $0x28] sm:$0xff] }
 0x872   :  { %1702 = vst.msk [vmem:[#allocation3 + $0x8] sm:$0xff] %vm76_vm0, %v1680_v5 }
 0x873   :  { %v1678_v6 = vpop.permute.xlu1 %1677  ;;  %v2093_v15 = vld [vmem:[#allocation3 + $0x20] sm:$0xff] }
 0x874   :  { %1701 = vst.msk [vmem:[#allocation3] sm:$0xff] %vm76_vm0, %v1678_v6 }
 0x875   :  { %v2245_v48 = vld [vmem:[#allocation3 + $0x18] sm:$0xff] }
 0x877   :  { %v2397_v62 = vld [vmem:[#allocation3 + $0x10] sm:$0xff] }
 0x87b   :  { %v3583_v7 = vpop.eup %3582 }
 0x87c   :  { %3374 = vmatmul.mubr.msk.f32.vlgmr.msra.gmra.mxu1 %vm76_vm0, %v3583_v7 }
 0x87d   :  { %3388 = vmatpush3.msra.mxu1 %v4054_v50  ;;  %3395 = vmatprep.mubr.msk.f32.mxu1 %vm3613_vm1, %v3612_v12 }
 0x87e   :  { %3389 = vmatprep.subr.mxu1 %v3612_v12 }
 0x87f   :  { %3390 = vmatpush3.msra.mxu1 %v4060_v54 }
 0x880   :  { %3391 = vmatprep.subr.mxu1 %v3612_v12 }
 0x881   :  { %3392 = vmatpush3.msra.mxu1 %v4071_v58 }
 0x882   :  { %3393 = vmatprep.subr.mxu1 %v3612_v12 }
 0x883   :  { %3394 = vmatpush3.msra.mxu1 %v4080_v59 }
 0x884   :  { %3409 = vmatprep.subr.mxu1 %v3612_v12 }
 0x8bf   :  { %v1783_v9 = vpop.f32.mrf.mxu0 }
 0x8c0   :  { %v1787_v10 = vadd.f32 %v1783_v9, %v1713_v8 }
 0x8c1   :  { %v3364_v11 = vpop.f32.mrf.mxu0 }
 0x8c2   :  { %3584 = vtanh.f32 %v1787_v10  ;;  %v2809_v10 = vld [vmem:[%s4316_s10 + $0x78] sm:$0xff]  ;;  %v2808_v11 = vld [vmem:[%s4316_s10 + $0x70] sm:$0xff] }
 0x8cf   :  { %v3585_v17 = vpop.eup %3584 }
 0x8d0   :  { %3385 = vmatmul.mubr.msk.f32.vlgmr.msra.gmra.mxu0 %vm76_vm0, %v3585_v17 }
 0x8d1   :  { %3399 = vmatpush3.msra.mxu0 %v4018_v22  ;;  %3406 = vmatprep.mubr.msk.f32.mxu0 %vm3613_vm1, %v3612_v12 }
 0x8d2   :  { %3400 = vmatprep.subr.mxu0 %v3612_v12 }
 0x8d3   :  { %3401 = vmatpush3.msra.mxu0 %v4024_v23 }
 0x8d4   :  { %3402 = vmatprep.subr.mxu0 %v3612_v12 }
 0x8d5   :  { %3403 = vmatpush3.msra.mxu0 %v4031_v24 }
 0x8d6   :  { %3404 = vmatprep.subr.mxu0 %v3612_v12 }
 0x8d7   :  { %3405 = vmatpush3.msra.mxu0 %v4038_v25 }
 0x8d8   :  { %3420 = vmatprep.subr.mxu0 %v3612_v12 }
 0x93c   :  { %v1859_v19 = vpop.f32.mrf.mxu1 }
 0x93d   :  { %v1863_v20 = vadd.f32 %v1859_v19, %v1789_v18  ;;  %v2807_v18 = vld [vmem:[%s4316_s10 + $0x68] sm:$0xff]  ;;  %v2806_v19 = vld [vmem:[%s4316_s10 + $0x60] sm:$0xff] }
 0x93e   :  { %v3375_v21 = vpop.f32.mrf.mxu1 }
 0x93f   :  { %3586 = vtanh.f32 %v1863_v20  ;;  %v2805_v20 = vld [vmem:[%s4316_s10 + $0x58] sm:$0xff]  ;;  %v2804_v21 = vld [vmem:[%s4316_s10 + $0x50] sm:$0xff] }
 0x94c   :  { %v3587_v26 = vpop.eup %3586 }
 0x94d   :  { %3396 = vmatmul.mubr.msk.f32.vlgmr.msra.gmra.mxu1 %vm76_vm0, %v3587_v26  ;;  %v2803_v26 = vld [vmem:[%s4316_s10 + $0x48] sm:$0xff] }
 0x94e   :  { %3410 = vmatpush3.msra.mxu1 %v4054_v50  ;;  %3417 = vmatprep.mubr.msk.f32.mxu1 %vm3613_vm1, %v3612_v12 }
 0x94f   :  { %3411 = vmatprep.subr.mxu1 %v3612_v12 }
 0x950   :  { %3412 = vmatpush3.msra.mxu1 %v4060_v54 }
 0x951   :  { %3413 = vmatprep.subr.mxu1 %v3612_v12 }
 0x952   :  { %3414 = vmatpush3.msra.mxu1 %v4071_v58 }
 0x953   :  { %3415 = vmatprep.subr.mxu1 %v3612_v12 }
 0x954   :  { %3416 = vmatpush3.msra.mxu1 %v4080_v59 }
 0x955   :  { %3431 = vmatprep.subr.mxu1 %v3612_v12 }
 0x990   :  { %v1935_v28 = vpop.f32.mrf.mxu0 }
 0x991   :  { %v1939_v29 = vadd.f32 %v1935_v28, %v1865_v27  ;;  %v2802_v27 = vld [vmem:[%s4316_s10 + $0x40] sm:$0xff]  ;;  %v2801_v28 = vld [vmem:[%s4316_s10 + $0x38] sm:$0xff] }
 0x992   :  { %v3386_v30 = vpop.f32.mrf.mxu0 }
 0x993   :  { %3588 = vtanh.f32 %v1939_v29  ;;  %v2800_v29 = vld [vmem:[%s4316_s10 + $0x30] sm:$0xff]  ;;  %v2799_v30 = vld [vmem:[%s4316_s10 + $0x28] sm:$0xff] }
 0x9a0   :  { %v3589_v31 = vpop.eup %3588 }
 0x9a1   :  { %3407 = vmatmul.mubr.msk.f32.vlgmr.msra.gmra.mxu0 %vm76_vm0, %v3589_v31  ;;  %v2798_v31 = vld [vmem:[%s4316_s10 + $0x20] sm:$0xff] }
 0x9a2   :  { %3421 = vmatpush3.msra.mxu0 %v4018_v22  ;;  %3428 = vmatprep.mubr.msk.f32.mxu0 %vm3613_vm1, %v3612_v12 }
 0x9a3   :  { %3422 = vmatprep.subr.mxu0 %v3612_v12 }
 0x9a4   :  { %3423 = vmatpush3.msra.mxu0 %v4024_v23 }
 0x9a5   :  { %3424 = vmatprep.subr.mxu0 %v3612_v12 }
 0x9a6   :  { %3425 = vmatpush3.msra.mxu0 %v4031_v24 }
 0x9a7   :  { %3426 = vmatprep.subr.mxu0 %v3612_v12 }
 0x9a8   :  { %3427 = vmatpush3.msra.mxu0 %v4038_v25 }
 0x9a9   :  { %3442 = vmatprep.subr.mxu0 %v3612_v12 }
 0xa0d   :  { %v2011_v33 = vpop.f32.mrf.mxu1 }
 0xa0e   :  { %v2015_v34 = vadd.f32 %v2011_v33, %v1941_v32  ;;  %v2797_v32 = vld [vmem:[%s4316_s10 + $0x18] sm:$0xff]  ;;  %v2796_v33 = vld [vmem:[%s4316_s10 + $0x10] sm:$0xff] }
 0xa0f   :  { %v3397_v36 = vpop.f32.mrf.mxu1 }
 0xa10   :  { %3590 = vtanh.f32 %v2015_v34  ;;  %v2795_v34 = vld [vmem:[%s4316_s10 + $0x8] sm:$0xff]  ;;  %v2701_v36 = vld [vmem:[#allocation3] sm:$0xff] }
 0xa1d   :  { %v3591_v40 = vpop.eup %3590 }
 0xa1e   :  { %3418 = vmatmul.mubr.msk.f32.vlgmr.msra.gmra.mxu1 %vm76_vm0, %v3591_v40 }
 0xa1f   :  { %3432 = vmatpush3.msra.mxu1 %v4054_v50  ;;  %3439 = vmatprep.mubr.msk.f32.mxu1 %vm3613_vm1, %v3612_v12 }
 0xa20   :  { %3433 = vmatprep.subr.mxu1 %v3612_v12 }
 0xa21   :  { %3434 = vmatpush3.msra.mxu1 %v4060_v54 }
 0xa22   :  { %3435 = vmatprep.subr.mxu1 %v3612_v12 }
 0xa23   :  { %3436 = vmatpush3.msra.mxu1 %v4071_v58 }
 0xa24   :  { %3437 = vmatprep.subr.mxu1 %v3612_v12 }
 0xa25   :  { %3438 = vmatpush3.msra.mxu1 %v4080_v59 }
 0xa26   :  { %3453 = vmatprep.subr.mxu1 %v3612_v12 }
 0xa61   :  { %v2087_v42 = vpop.f32.mrf.mxu0 }
 0xa62   :  { %v2091_v43 = vadd.f32 %v2087_v42, %v2017_v41 }
 0xa63   :  { %v3408_v13 = vpop.f32.mrf.mxu0 }
 0xa64   :  { %3592 = vtanh.f32 %v2091_v43  ;;  %v2794_v43 = vld [vmem:[%s4316_s10] sm:$0xff] }
 0xa71   :  { %v3593_v14 = vpop.eup %3592 }
 0xa72   :  { %3429 = vmatmul.mubr.msk.f32.vlgmr.msra.gmra.mxu0 %vm76_vm0, %v3593_v14  ;;  %v2779_v14 = vpop.permute.xlu0 %2778 }
 0xa73   :  { %3443 = vmatpush3.msra.mxu0 %v4018_v22  ;;  %3450 = vmatprep.mubr.msk.f32.mxu0 %vm3613_vm1, %v3612_v12 }
 0xa74   :  { %3444 = vmatprep.subr.mxu0 %v3612_v12 }
 0xa75   :  { %3445 = vmatpush3.msra.mxu0 %v4024_v23 }
 0xa76   :  { %3446 = vmatprep.subr.mxu0 %v3612_v12 }
 0xa77   :  { %3447 = vmatpush3.msra.mxu0 %v4031_v24 }
 0xa78   :  { %3448 = vmatprep.subr.mxu0 %v3612_v12 }
 0xa79   :  { %3449 = vmatpush3.msra.mxu0 %v4038_v25 }
 0xa7a   :  { %3464 = vmatprep.subr.mxu0 %v3612_v12 }
 0xade   :  { %v2163_v16 = vpop.f32.mrf.mxu1 }
 0xadf   :  { %v2167_v44 = vadd.f32 %v2163_v16, %v2093_v15 }
 0xae0   :  { %v3419_v35 = vpop.f32.mrf.mxu1 }
 0xae1   :  { %3594 = vtanh.f32 %v2167_v44 }
 0xaee   :  { %v3595_v45 = vpop.eup %3594 }
 0xaef   :  { %3440 = vmatmul.mubr.msk.f32.vlgmr.msra.gmra.mxu1 %vm76_vm0, %v3595_v45  ;;  %v2946_v45 = vld [vmem:[%s4317_s11] ss:$0 sm:$0xff] }
 0xaf0   :  { %3454 = vmatpush3.msra.mxu1 %v4054_v50  ;;  %3461 = vmatprep.mubr.msk.f32.mxu1 %vm3613_vm1, %v3612_v12 }
 0xaf1   :  { %3455 = vmatprep.subr.mxu1 %v3612_v12 }
 0xaf2   :  { %3456 = vmatpush3.msra.mxu1 %v4060_v54 }
 0xaf3   :  { %3457 = vmatprep.subr.mxu1 %v3612_v12 }
 0xaf4   :  { %3458 = vmatpush3.msra.mxu1 %v4071_v58 }
 0xaf5   :  { %3459 = vmatprep.subr.mxu1 %v3612_v12 }
 0xaf6   :  { %3460 = vmatpush3.msra.mxu1 %v4080_v59 }
 0xaf7   :  { %3475 = vmatprep.subr.mxu1 %v3612_v12 }
 0xb32   :  { %v2239_v38 = vpop.f32.mrf.mxu0 }
 0xb33   :  { %v2243_v46 = vadd.f32 %v2239_v38, %v2169_v37 }
 0xb34   :  { %v3430_v47 = vpop.f32.mrf.mxu0 }
 0xb35   :  { %3596 = vtanh.f32 %v2243_v46 }
 0xb42   :  { %v3597_v39 = vpop.eup %3596 }
 0xb43   :  { %3451 = vmatmul.mubr.msk.f32.vlgmr.msra.gmra.mxu0 %vm76_vm0, %v3597_v39 }
 0xb44   :  { %3465 = vmatpush3.msra.mxu0 %v4018_v22  ;;  %3472 = vmatprep.mubr.msk.f32.mxu0 %vm3613_vm1, %v3612_v12 }
 0xb45   :  { %3466 = vmatprep.subr.mxu0 %v3612_v12 }
 0xb46   :  { %3467 = vmatpush3.msra.mxu0 %v4024_v23 }
 0xb47   :  { %3468 = vmatprep.subr.mxu0 %v3612_v12 }
 0xb48   :  { %3469 = vmatpush3.msra.mxu0 %v4031_v24 }
 0xb49   :  { %3470 = vmatprep.subr.mxu0 %v3612_v12 }
 0xb4a   :  { %3471 = vmatpush3.msra.mxu0 %v4038_v25 }
 0xb4b   :  { %3486 = vmatprep.subr.mxu0 %v3612_v12 }
 0xbaf   :  { %v2315_v49 = vpop.f32.mrf.mxu1 }
 0xbb0   :  { %v2319_v51 = vadd.f32 %v2315_v49, %v2245_v48 }
 0xbb1   :  { %v3441_v52 = vpop.f32.mrf.mxu1 }
 0xbb2   :  { %3598 = vtanh.f32 %v2319_v51 }
 0xbbf   :  { %v3599_v53 = vpop.eup %3598 }
 0xbc0   :  { %3462 = vmatmul.mubr.msk.f32.vlgmr.msra.gmra.mxu1 %vm76_vm0, %v3599_v53 }
 0xbc1   :  { %3476 = vmatpush3.msra.mxu1 %v4054_v50  ;;  %3483 = vmatprep.mubr.msk.f32.mxu1 %vm3613_vm1, %v3612_v12 }
 0xbc2   :  { %3477 = vmatprep.subr.mxu1 %v3612_v12 }
 0xbc3   :  { %3478 = vmatpush3.msra.mxu1 %v4060_v54 }
 0xbc4   :  { %3479 = vmatprep.subr.mxu1 %v3612_v12 }
 0xbc5   :  { %3480 = vmatpush3.msra.mxu1 %v4071_v58 }
 0xbc6   :  { %3481 = vmatprep.subr.mxu1 %v3612_v12 }
 0xbc7   :  { %3482 = vmatpush3.msra.mxu1 %v4080_v59 }
 0xbc8   :  { %3497 = vmatprep.subr.mxu1 %v3612_v12 }
 0xc03   :  { %v2391_v56 = vpop.f32.mrf.mxu0 }
 0xc04   :  { %v2395_v57 = vadd.f32 %v2391_v56, %v2321_v55 }
 0xc05   :  { %v3452_v60 = vpop.f32.mrf.mxu0 }
 0xc06   :  { %3600 = vtanh.f32 %v2395_v57 }
 0xc13   :  { %v3601_v61 = vpop.eup %3600 }
 0xc14   :  { %3473 = vmatmul.mubr.msk.f32.vlgmr.msra.gmra.mxu0 %vm76_vm0, %v3601_v61 }
 0xc15   :  { %3487 = vmatpush3.msra.mxu0 %v4018_v22  ;;  %3494 = vmatprep.mubr.msk.f32.mxu0 %vm3613_vm1, %v3612_v12 }
 0xc16   :  { %3488 = vmatprep.subr.mxu0 %v3612_v12 }
 0xc17   :  { %3489 = vmatpush3.msra.mxu0 %v4024_v23  ;;  %v2473_v23 = vld [vmem:[#allocation2 + $0x30] sm:$0xff] }
 0xc18   :  { %3490 = vmatprep.subr.mxu0 %v3612_v12 }
 0xc19   :  { %3491 = vmatpush3.msra.mxu0 %v4031_v24 }
 0xc1a   :  { %3492 = vmatprep.subr.mxu0 %v3612_v12 }
 0xc1b   :  { %3493 = vmatpush3.msra.mxu0 %v4038_v25 }
 0xc1c   :  { %3508 = vmatprep.subr.mxu0 %v3612_v12 }
 0xc80   :  { %v2467_v63 = vpop.f32.mrf.mxu1 }
 0xc81   :  { %v2471_v22 = vadd.f32 %v2467_v63, %v2397_v62 }
 0xc82   :  { %v3463_v1 = vpop.f32.mrf.mxu1 }
 0xc83   :  { %3602 = vtanh.f32 %v2471_v22 }
 0xc90   :  { %v3603_v2 = vpop.eup %3602 }
 0xc91   :  { %3484 = vmatmul.mubr.msk.f32.vlgmr.msra.gmra.mxu1 %vm76_vm0, %v3603_v2 }
 0xc92   :  { %3498 = vmatpush3.msra.mxu1 %v4054_v50  ;;  %3505 = vmatprep.mubr.msk.f32.mxu1 %vm3613_vm1, %v3612_v12 }
 0xc93   :  { %3499 = vmatprep.subr.mxu1 %v3612_v12 }
 0xc94   :  { %3500 = vmatpush3.msra.mxu1 %v4060_v54  ;;  %v2549_v54 = vld [vmem:[#allocation3 + $0x8] sm:$0xff] }
 0xc95   :  { %3501 = vmatprep.subr.mxu1 %v3612_v12 }
 0xc96   :  { %3502 = vmatpush3.msra.mxu1 %v4071_v58 }
 0xc97   :  { %3503 = vmatprep.subr.mxu1 %v3612_v12 }
 0xc98   :  { %3504 = vmatpush3.msra.mxu1 %v4080_v59  ;;  %v2625_v59 = vld [vmem:[#allocation2 + $0x38] sm:$0xff] }
 0xcd4   :  { %v2543_v24 = vpop.f32.mrf.mxu0 }
 0xcd5   :  { %v2547_v25 = vadd.f32 %v2543_v24, %v2473_v23 }
 0xcd6   :  { %v3474_v3 = vpop.f32.mrf.mxu0 }
 0xcd7   :  { %3604 = vtanh.f32 %v2547_v25 }
 0xce4   :  { %v3605_v50 = vpop.eup %3604 }
 0xce5   :  { %3495 = vmatmul.mubr.msk.f32.vlgmr.msra.gmra.mxu0 %vm76_vm0, %v3605_v50 }
 0xce6   :  { %3540 = vmatprep.mubr.msk.f32.mxu0 %vm3613_vm1, %v3612_v12  ;;  %3509 = vmatpush3.msra.mxu0 %v2809_v10 }
 0xce7   :  { %3510 = vmatprep.subr.mxu0 %v3612_v12 }
 0xce8   :  { %3511 = vmatpush3.msra.mxu0 %v2808_v11 }
 0xce9   :  { %3512 = vmatprep.subr.mxu0 %v3612_v12 }
 0xcea   :  { %3513 = vmatpush3.msra.mxu0 %v2807_v18 }
 0xceb   :  { %3514 = vmatprep.subr.mxu0 %v3612_v12 }
 0xcec   :  { %3515 = vmatpush3.msra.mxu0 %v2806_v19 }
 0xced   :  { %3516 = vmatprep.subr.mxu0 %v3612_v12 }
 0xcee   :  { %3517 = vmatpush3.msra.mxu0 %v2805_v20 }
 0xcef   :  { %3518 = vmatprep.subr.mxu0 %v3612_v12 }
 0xcf0   :  { %3519 = vmatpush3.msra.mxu0 %v2804_v21 }
 0xcf1   :  { %3520 = vmatprep.subr.mxu0 %v3612_v12 }
 0xcf2   :  { %3521 = vmatpush3.msra.mxu0 %v2803_v26 }
 0xcf3   :  { %3522 = vmatprep.subr.mxu0 %v3612_v12 }
 0xcf4   :  { %3523 = vmatpush3.msra.mxu0 %v2802_v27 }
 0xcf5   :  { %3524 = vmatprep.subr.mxu0 %v3612_v12 }
 0xcf6   :  { %3525 = vmatpush3.msra.mxu0 %v2801_v28 }
 0xcf7   :  { %3526 = vmatprep.subr.mxu0 %v3612_v12 }
 0xcf8   :  { %3527 = vmatpush3.msra.mxu0 %v2800_v29 }
 0xcf9   :  { %3528 = vmatprep.subr.mxu0 %v3612_v12 }
 0xcfa   :  { %3529 = vmatpush3.msra.mxu0 %v2799_v30 }
 0xcfb   :  { %3530 = vmatprep.subr.mxu0 %v3612_v12 }
 0xcfc   :  { %3531 = vmatpush3.msra.mxu0 %v2798_v31 }
 0xcfd   :  { %3532 = vmatprep.subr.mxu0 %v3612_v12 }
 0xcfe   :  { %3533 = vmatpush3.msra.mxu0 %v2797_v32 }
 0xcff   :  { %3534 = vmatprep.subr.mxu0 %v3612_v12 }
 0xd00   :  { %3535 = vmatpush3.msra.mxu0 %v2796_v33 }
 0xd01   :  { %3536 = vmatprep.subr.mxu0 %v3612_v12 }
 0xd02   :  { %3537 = vmatpush3.msra.mxu0 %v2795_v34 }
 0xd03   :  { %3538 = vmatprep.subr.mxu0 %v3612_v12  ;;  %v2789_v12 = vsel %vm76_vm0, %v3987_v0, %v2779_v14 }
 0xd04   :  { %3539 = vmatpush3.msra.mxu0 %v2794_v43 }
 0xd51   :  { %v2619_v4 = vpop.f32.mrf.mxu1 }
 0xd52   :  { %v2623_v5 = vadd.f32 %v2619_v4, %v2549_v54 }
 0xd53   :  { %v3485_v6 = vpop.f32.mrf.mxu1 }
 0xd54   :  { %3606 = vtanh.f32 %v2623_v5 }
 0xd61   :  { %v3607_v58 = vpop.eup %3606 }
 0xd62   :  { %3506 = vmatmul.mubr.msk.f32.vlgmr.msra.gmra.mxu1 %vm76_vm0, %v3607_v58 }
 0xda5   :  { %v2695_v7 = vpop.f32.mrf.mxu0 }
 0xda6   :  { %v2699_v8 = vadd.f32 %v2695_v7, %v2625_v59 }
 0xda7   :  { %v3496_v9 = vpop.f32.mrf.mxu0 }
 0xda8   :  { %3608 = vtanh.f32 %v2699_v8 }
 0xdb5   :  { %v3609_v17 = vpop.eup %3608 }
 0xdb6   :  { %2782 = vrot.lane.b32.xlu1 %v3609_v17, %s3616_s14 }
 0xe22   :  { %v2771_v40 = vpop.f32.mrf.mxu1 }
 0xe23   :  { %v2775_v41 = vadd.f32 %v2771_v40, %v2701_v36 }
 0xe24   :  { %v3507_v42 = vpop.f32.mrf.mxu1 }
 0xe25   :  { %3610 = vtanh.f32 %v2775_v41 }
 0xe28   :  { %v2783_v15 = vpop.permute.xlu1 %2782 }
 0xe29   :  { %v2791_v16 = vsel %vm2790_vm2, %v2789_v12, %v2783_v15 }
 0xe32   :  { %v3611_v13 = vpop.eup %3610 }
 0xe33   :  { %2786 = vrot.lane.b32.xlu0 %v3611_v13, %s3614_s2 }
 0xea5   :  { %v2787_v44 = vpop.permute.xlu0 %2786 }
 0xea6   :  { %v2793_v35 = vsel %vm2792_vm3, %v2791_v16, %v2787_v44 }
 0xea7   :  { %3541 = vmatmul.mubr.f32.vlgmr.msra.gmra.mxu0 %v2793_v35 }
 0xf67   :  { %v2883_v37 = vpop.f32.mrf.mxu0 }
 0xf68   :  { %v2884_v38 = vadd.f32 %v2946_v45, %v2883_v37 }
 0xf69   :  { %v3542_v46 = vpop.f32.mrf.mxu0 }
 0xf6a   :  { %2887 = vst [vmem:[%s4318_s12] sm:$0xff] %v2884_v38 }

</bundles_post_ra>
